<compile_context>
chip_gen: v7x
topology: tpu7x:2x2x1
jax: 0.10.0
libtpu: 0.0.40
codegen_flags: <defaults>
</compile_context>

<pallas_src>
import functools

import jax
import jax.numpy as jnp
from jax.experimental import pallas as pl
from jax.experimental.pallas import tpu as pltpu


def _expert_ffn_kernel(x_ref, w1_ref, b1_ref, w2_ref, b2_ref, g_ref, o_ref,
                       acc_ref):
    """One grid step = (expert e, capacity tile c, hidden tile h)."""
    h_idx = pl.program_id(2)

    @pl.when(h_idx == 0)
    def _init():
        acc_ref[...] = jnp.zeros_like(acc_ref)

    x = x_ref[0]                                                       # (tC, D) bf16
    h = jnp.dot(x, w1_ref[0], preferred_element_type=jnp.float32)      # (tC, tH) f32
    h = jnp.maximum(h + b1_ref[0], 0.0).astype(w2_ref.dtype)           # bias+ReLU f32 -> bf16
    acc_ref[...] += jnp.dot(h, w2_ref[0],
                            preferred_element_type=jnp.float32)        # (tC, D) f32

    @pl.when(h_idx == pl.num_programs(2) - 1)
    def _finalize():
        y = acc_ref[...] + b2_ref[0]                                   # f32
        o_ref[0] = (y * g_ref[0]).astype(o_ref.dtype)                  # row-wise gate


def _pick_tile(n, cap, align):
    """Largest divisor of n that is <= cap and a multiple of `align`; else n."""
    if n <= cap:
        return n
    t = (cap // align) * align
    while t >= align:
        if n % t == 0:
            return t
        t -= align
    return n


def _vmem_limit_bytes(tC, D, tH, out_itemsize, mxu_itemsize):
    x_b = 2 * tC * D * mxu_itemsize                 # token tile, double-buffered
    w_b = 2 * (D * tH + tH * D) * mxu_itemsize      # W1/W2 tiles, double-buffered
    bias = 2 * (tH + D) * 4
    gate = 2 * tC * 4
    out_b = 2 * tC * D * out_itemsize
    acc = tC * D * 4
    est = x_b + w_b + bias + gate + out_b + acc
    # Generous headroom, clamped so it fits every generation (v7x: 64 MiB VMEM).
    return int(min(max(2 * est, 32 * 1024 * 1024), 64 * 1024 * 1024))


def expert_ffn_pallas(x_g, w1, b1, w2, b2, gates, *, out_dtype,
                      mxu_dtype=jnp.bfloat16, block_c=512, block_h=None):
    """x_g:(E,C,D) gathered tokens; w1:(Ew,D,H); b1:(Ew,1,H); w2:(Ew,H,D);
    b2:(Ew,1,D); gates:(E,C,1). Ew is 1 (shared weights) or E.
    Returns gated expert outputs (E,C,D) in out_dtype."""
    E, C, D = x_g.shape
    Ew, _, H = w1.shape
    assert Ew in (1, E)
    shared = Ew == 1

    mxu_isize = jnp.dtype(mxu_dtype).itemsize
    out_isize = jnp.dtype(out_dtype).itemsize

    tC = _pick_tile(C, block_c, 8)
    if block_h is None:
        # Keep double-buffered W1+W2 column tiles under ~24 MiB (v7x-safe budget).
        block_h = max(128, (24 * 1024 * 1024) // (4 * D * mxu_isize))
    tH = _pick_tile(H, block_h, 128)

    x_g = x_g.astype(mxu_dtype)
    w1c = w1.astype(mxu_dtype)
    w2c = w2.astype(mxu_dtype)
    b1c = b1.astype(jnp.float32)
    b2c = b2.astype(jnp.float32)
    gates = gates.astype(jnp.float32)

    grid = (E, C // tC, H // tH)

    cost = pl.CostEstimate(
        flops=4 * E * C * D * H,        # two matmuls, 2 flops per MAC
        transcendentals=0,
        bytes_accessed=int(
            x_g.size * mxu_isize
            + w1c.size * mxu_isize + w2c.size * mxu_isize
            + b1c.size * 4 + b2c.size * 4 + gates.size * 4
            + E * C * D * out_isize),
    )

    return pl.pallas_call(
        _expert_ffn_kernel,
        out_shape=jax.ShapeDtypeStruct((E, C, D), out_dtype),
        grid_spec=pltpu.PrefetchScalarGridSpec(
            num_scalar_prefetch=0,
            grid=grid,
            in_specs=[
                # tokens: re-fetched per (e, c), resident across the h axis
                pl.BlockSpec((1, tC, D), lambda e, c, h: (e, c, 0)),
                # weights/biases: constant block index when shared -> DMA'd once,
                # stay resident in VMEM for the whole grid.
                pl.BlockSpec((1, D, tH),
                             lambda e, c, h: ((0 if shared else e), 0, h)),
                pl.BlockSpec((1, 1, tH),
                             lambda e, c, h: ((0 if shared else e), 0, h)),
                pl.BlockSpec((1, tH, D),
                             lambda e, c, h: ((0 if shared else e), h, 0)),
                pl.BlockSpec((1, 1, D),
                             lambda e, c, h: ((0 if shared else e), 0, 0)),
                # per-row gate weights (tiny block; masked load is acceptable)
                pl.BlockSpec((1, tC, 1), lambda e, c, h: (e, c, 0)),
            ],
            out_specs=pl.BlockSpec((1, tC, D), lambda e, c, h: (e, c, 0)),
            scratch_shapes=[pltpu.VMEM((tC, D), jnp.float32)],
        ),
        compiler_params=pltpu.CompilerParams(
            dimension_semantics=("parallel", "parallel", "arbitrary"),
            vmem_limit_bytes=_vmem_limit_bytes(tC, D, tH, out_isize, mxu_isize),
        ),
        cost_estimate=cost,
    )(x_g, w1c, b1c, w2c, b2c, gates)


def experts_forward(inputs, inputs_weight, top_idx, params, *,
                    mxu_dtype=jnp.bfloat16, unique_routing=False):
    """Mirrors Experts.forward.

    inputs:        (N, D) float tokens
    inputs_weight: (N, E) routing weights
    top_idx:       (C, E) int token indices; column e = tokens routed to expert e
    params:        (w1, b1, w2, b2) with leading dim 1 (shared weights) or E
    unique_routing: set True only when every token index appears at most once
                    across ALL expert columns (disjoint routing) — enables the
                    fast unique-indices scatter.
    """
    w1, b1, w2, b2 = params
    E = top_idx.shape[1]
    D = inputs.shape[-1]

    tok = top_idx.T                                              # (E, C) token ids
    # Gather in the MXU dtype so the intermediate slab costs half the HBM bytes.
    x_g = jnp.take(inputs.astype(mxu_dtype), tok, axis=0)        # (E, C, D)
    # gates[e, c] = inputs_weight[tok[e, c], e]  (== inputs_weight[:, e][token_idx])
    gates = inputs_weight[tok, jnp.arange(E)[:, None]].astype(jnp.float32)
    gates = gates[..., None]                                     # (E, C, 1)

    out = expert_ffn_pallas(x_g, w1, b1, w2, b2, gates,
                            out_dtype=inputs.dtype, mxu_dtype=mxu_dtype)

    flat_tok = tok.reshape(-1)
    flat_out = out.reshape(-1, D)
    if unique_routing:
        expert_output = jnp.zeros_like(inputs).at[flat_tok].add(
            flat_out, unique_indices=True, mode="drop")
    else:
        # General case: same token may be routed to several experts; accumulate
        # exactly like the sequential PyTorch `+=` loop.
        expert_output = jnp.zeros_like(inputs).at[flat_tok].add(flat_out)

    # No expert returned a tuple -> out_non_zero_ratio = -1.0, then / num_experts.
    out_non_zero_ratio = jnp.asarray(-1.0, dtype=jnp.float32) / E
    return expert_output, out_non_zero_ratio


def _reference(inputs, inputs_weight, top_idx, params, mxu_dtype=jnp.bfloat16):
    """Pure-JAX transcription of the PyTorch forward (same bf16 MXU casts as the
    kernel so the comparison is tight)."""
    w1, b1, w2, b2 = params
    E = top_idx.shape[1]
    shared = w1.shape[0] == 1
    expert_output = jnp.zeros_like(inputs)
    for e in range(E):
        we = 0 if shared else e
        tok = top_idx[:, e]
        x = inputs[tok].astype(mxu_dtype)
        h = jnp.dot(x, w1[we].astype(mxu_dtype),
                    preferred_element_type=jnp.float32)
        h = jnp.maximum(h + b1[we, 0].astype(jnp.float32), 0.0).astype(mxu_dtype)
        y = jnp.dot(h, w2[we].astype(mxu_dtype),
                    preferred_element_type=jnp.float32) + b2[we, 0]
        g = inputs_weight[tok, e][:, None].astype(jnp.float32)
        expert_output = expert_output.at[tok].add((y * g).astype(inputs.dtype))
    return expert_output, jnp.asarray(-1.0, jnp.float32) / E


if __name__ == "__main__":
    # Small but MXU-shaped: capacity a multiple of 256, lane-aligned D/H.
    E, C = 2, 256          # num_local_experts, capacity per expert
    D, H = 256, 512        # d_model, ffn hidden
    N = E * C              # tokens (disjoint routing: C*E == N)

    key = jax.random.PRNGKey(0)
    k_in, k_w, k_idx, k_w1, k_b1, k_w2, k_b2 = jax.random.split(key, 7)

    inputs = jax.random.normal(k_in, (N, D), dtype=jnp.float32)
    inputs_weight = jax.nn.softmax(
        jax.random.normal(k_w, (N, E), dtype=jnp.float32), axis=-1)
    # Disjoint routing: a permutation of all tokens split across the E columns.
    top_idx = jax.random.permutation(k_idx, N).reshape(C, E).astype(jnp.int32)

    # Single expert init (deepcopy semantics -> identical weights). Stored ONCE
    # (leading dim 1); the kernel keeps it resident in VMEM across all experts.
    w1 = jax.random.normal(k_w1, (1, D, H), jnp.float32) * (1.0 / jnp.sqrt(D))
    b1 = jax.random.normal(k_b1, (1, 1, H), jnp.float32) * 0.01
    w2 = jax.random.normal(k_w2, (1, H, D), jnp.float32) * (1.0 / jnp.sqrt(H))
    b2 = jax.random.normal(k_b2, (1, 1, D), jnp.float32) * 0.01
    params = (w1, b1, w2, b2)

    fwd = jax.jit(functools.partial(experts_forward, unique_routing=True))
    out, ratio = fwd(inputs, inputs_weight, top_idx, params)
    jax.block_until_ready((out, ratio))

    ref_out, ref_ratio = _reference(inputs, inputs_weight, top_idx, params)
    assert out.shape == inputs.shape and out.dtype == inputs.dtype
    max_err = float(jnp.max(jnp.abs(out - ref_out)))
    assert jnp.allclose(out, ref_out, atol=1e-3, rtol=1e-3), max_err
    assert jnp.allclose(ratio, ref_ratio)

    print("KERNEL_OK")
</pallas_src>

<mosaic_0001>
module attributes {stable_mosaic.version = 11 : i64} {
  func.func @_expert_ffn_kernel(%arg0: i32, %arg1: i32, %arg2: i32, %arg3: memref<1x256x256xbf16, #tpu.memory_space<vmem>>, %arg4: memref<1x256x512xbf16, #tpu.memory_space<vmem>>, %arg5: memref<1x1x512xf32, #tpu.memory_space<vmem>>, %arg6: memref<1x512x256xbf16, #tpu.memory_space<vmem>>, %arg7: memref<1x1x256xf32, #tpu.memory_space<vmem>>, %arg8: memref<1x256x1xf32, #tpu.memory_space<vmem>>, %arg9: memref<1x256x256xf32, #tpu.memory_space<vmem>>, %arg10: memref<256x256xf32, #tpu.memory_space<vmem>>) attributes {dimension_semantics = [#tpu.dimension_semantics<parallel>, #tpu.dimension_semantics<parallel>, #tpu.dimension_semantics<arbitrary>], iteration_bounds = array<i64: 2, 1, 1>, scalar_prefetch = 0 : i64, scratch_operands = 1 : i64, tpu.core_type = #tpu.core_type<tc>, window_params = [{transform_indices = @transform_0, window_bounds = array<i64: 1, 256, 256>}, {transform_indices = @transform_1, window_bounds = array<i64: 1, 256, 512>}, {transform_indices = @transform_2, window_bounds = array<i64: 1, 1, 512>}, {transform_indices = @transform_3, window_bounds = array<i64: 1, 512, 256>}, {pipeline_mode = #tpu.pipeline_mode<synchronous>, transform_indices = @transform_4, window_bounds = array<i64: 1, 1, 256>}, {transform_indices = @transform_5, window_bounds = array<i64: 1, 256, 1>}, {transform_indices = @transform_6, window_bounds = array<i64: 1, 256, 256>}]} {
    %c0_i32 = arith.constant 0 : i32
    %0 = arith.cmpi eq, %arg2, %c0_i32 : i32
    %1 = arith.extui %0 : i1 to i32
    %c0_i32_0 = arith.constant 0 : i32
    %2 = arith.cmpi ne, %1, %c0_i32_0 : i32
    scf.if %2 {
      %cst_20 = arith.constant 0.000000e+00 : f32
      %24 = vector.broadcast %cst_20 : f32 to vector<256x256xf32>
      %c0_21 = arith.constant 0 : index
      %c0_22 = arith.constant 0 : index
      %25 = vector.load %arg10[%c0_21, %c0_22] : memref<256x256xf32, #tpu.memory_space<vmem>>, vector<256x256xf32>
      tpu.vector_store %arg10[%c0_21, %c0_22], %24 {strides = array<i32>} : memref<256x256xf32, #tpu.memory_space<vmem>>, vector<256x256xf32>,
    } else {
    }
    %c0 = arith.constant 0 : index
    %c0_1 = arith.constant 0 : index
    %c0_2 = arith.constant 0 : index
    %3 = vector.load %arg3[%c0, %c0_1, %c0_2] : memref<1x256x256xbf16, #tpu.memory_space<vmem>>, vector<1x256x256xbf16>
    %4 = vector.shape_cast %3 : vector<1x256x256xbf16> to vector<256x256xbf16>
    %c0_3 = arith.constant 0 : index
    %c0_4 = arith.constant 0 : index
    %c0_5 = arith.constant 0 : index
    %5 = vector.load %arg4[%c0_3, %c0_4, %c0_5] : memref<1x256x512xbf16, #tpu.memory_space<vmem>>, vector<1x256x512xbf16>
    %6 = vector.shape_cast %5 : vector<1x256x512xbf16> to vector<256x512xbf16>
    %cst = arith.constant dense<0.000000e+00> : vector<256x512xf32>
    %7 = tpu.matmul %4, %6, %cst {dimension_numbers = #tpu.dot_dimension_numbers<[1], [0], [0], [1], [0, 0, 1, 1], [], []>} : vector<256x256xbf16>, vector<256x512xbf16>, vector<256x512xf32> -> vector<256x512xf32>
    %c0_6 = arith.constant 0 : index
    %c0_7 = arith.constant 0 : index
    %c0_8 = arith.constant 0 : index
    %8 = vector.load %arg5[%c0_6, %c0_7, %c0_8] : memref<1x1x512xf32, #tpu.memory_space<vmem>>, vector<1x1x512xf32>
    %9 = vector.shape_cast %8 : vector<1x1x512xf32> to vector<1x512xf32>
    %10 = vector.broadcast %9 : vector<1x512xf32> to vector<256x512xf32>
    %11 = arith.addf %7, %10 : vector<256x512xf32>
    %cst_9 = arith.constant 0.000000e+00 : f32
    %12 = vector.broadcast %cst_9 : f32 to vector<256x512xf32>
    %13 = arith.maximumf %11, %12 : vector<256x512xf32>
    %14 = arith.truncf %13 : vector<256x512xf32> to vector<256x512xbf16>
    %c0_10 = arith.constant 0 : index
    %c0_11 = arith.constant 0 : index
    %15 = vector.load %arg10[%c0_10, %c0_11] : memref<256x256xf32, #tpu.memory_space<vmem>>, vector<256x256xf32>
    %c0_12 = arith.constant 0 : index
    %c0_13 = arith.constant 0 : index
    %c0_14 = arith.constant 0 : index
    %16 = vector.load %arg6[%c0_12, %c0_13, %c0_14] : memref<1x512x256xbf16, #tpu.memory_space<vmem>>, vector<1x512x256xbf16>
    %17 = vector.shape_cast %16 : vector<1x512x256xbf16> to vector<512x256xbf16>
    %cst_15 = arith.constant dense<0.000000e+00> : vector<256x256xf32>
    %18 = tpu.matmul %14, %17, %cst_15 {dimension_numbers = #tpu.dot_dimension_numbers<[1], [0], [0], [1], [0, 0, 1, 1], [], []>} : vector<256x512xbf16>, vector<512x256xbf16>, vector<256x256xf32> -> vector<256x256xf32>
    %19 = arith.addf %15, %18 : vector<256x256xf32>
    %c0_16 = arith.constant 0 : index
    %c0_17 = arith.constant 0 : index
    %20 = vector.load %arg10[%c0_16, %c0_17] : memref<256x256xf32, #tpu.memory_space<vmem>>, vector<256x256xf32>
    tpu.vector_store %arg10[%c0_16, %c0_17], %19 {strides = array<i32>} : memref<256x256xf32, #tpu.memory_space<vmem>>, vector<256x256xf32>,
    %c0_i32_18 = arith.constant 0 : i32
    %21 = arith.cmpi eq, %arg2, %c0_i32_18 : i32
    %22 = arith.extui %21 : i1 to i32
    %c0_i32_19 = arith.constant 0 : i32
    %23 = arith.cmpi ne, %22, %c0_i32_19 : i32
    scf.if %23 {
      %c0_20 = arith.constant 0 : index
      %c0_21 = arith.constant 0 : index
      %24 = vector.load %arg10[%c0_20, %c0_21] : memref<256x256xf32, #tpu.memory_space<vmem>>, vector<256x256xf32>
      %c0_22 = arith.constant 0 : index
      %c0_23 = arith.constant 0 : index
      %c0_24 = arith.constant 0 : index
      %25 = vector.load %arg7[%c0_22, %c0_23, %c0_24] : memref<1x1x256xf32, #tpu.memory_space<vmem>>, vector<1x1x256xf32>
      %26 = vector.shape_cast %25 : vector<1x1x256xf32> to vector<1x256xf32>
      %27 = vector.broadcast %26 : vector<1x256xf32> to vector<256x256xf32>
      %28 = arith.addf %24, %27 : vector<256x256xf32>
      %c0_25 = arith.constant 0 : index
      %c0_26 = arith.constant 0 : index
      %c0_27 = arith.constant 0 : index
      %29 = vector.load %arg8[%c0_25, %c0_26, %c0_27] : memref<1x256x1xf32, #tpu.memory_space<vmem>>, vector<1x256x1xf32>
      %30 = vector.shape_cast %29 : vector<1x256x1xf32> to vector<256x1xf32>
      %31 = vector.broadcast %30 : vector<256x1xf32> to vector<256x256xf32>
      %32 = arith.mulf %28, %31 : vector<256x256xf32>
      %c0_28 = arith.constant 0 : index
      %c0_29 = arith.constant 0 : index
      %c0_30 = arith.constant 0 : index
      %33 = vector.load %arg9[%c0_28, %c0_29, %c0_30] : memref<1x256x256xf32, #tpu.memory_space<vmem>>, vector<1x256x256xf32>
      %34 = vector.shape_cast %33 : vector<1x256x256xf32> to vector<256x256xf32>
      %35 = vector.shape_cast %32 : vector<256x256xf32> to vector<1x256x256xf32>
      tpu.vector_store %arg9[%c0_28, %c0_29, %c0_30], %35 {strides = array<i32>} : memref<1x256x256xf32, #tpu.memory_space<vmem>>, vector<1x256x256xf32>,
    } else {
    }
    return
  }
  func.func @transform_0(%arg0: i32, %arg1: i32, %arg2: i32) -> (i32, i32, i32) {
    %c0_i32 = arith.constant 0 : i32
    %c0_i32_0 = arith.constant 0 : i32
    return %arg0, %arg1, %c0_i32 : i32, i32, i32
  }
  func.func @transform_1(%arg0: i32, %arg1: i32, %arg2: i32) -> (i32, i32, i32) {
    %c0_i32 = arith.constant 0 : i32
    %c0_i32_0 = arith.constant 0 : i32
    %c0_i32_1 = arith.constant 0 : i32
    return %c0_i32, %c0_i32_0, %arg2 : i32, i32, i32
  }
  func.func @transform_2(%arg0: i32, %arg1: i32, %arg2: i32) -> (i32, i32, i32) {
    %c0_i32 = arith.constant 0 : i32
    %c0_i32_0 = arith.constant 0 : i32
    %c0_i32_1 = arith.constant 0 : i32
    return %c0_i32, %c0_i32_0, %arg2 : i32, i32, i32
  }
  func.func @transform_3(%arg0: i32, %arg1: i32, %arg2: i32) -> (i32, i32, i32) {
    %c0_i32 = arith.constant 0 : i32
    %c0_i32_0 = arith.constant 0 : i32
    %c0_i32_1 = arith.constant 0 : i32
    return %c0_i32, %arg2, %c0_i32_0 : i32, i32, i32
  }
  func.func @transform_4(%arg0: i32, %arg1: i32, %arg2: i32) -> (i32, i32, i32) {
    %c0_i32 = arith.constant 0 : i32
    %c0_i32_0 = arith.constant 0 : i32
    %c0_i32_1 = arith.constant 0 : i32
    %c0_i32_2 = arith.constant 0 : i32
    return %c0_i32, %c0_i32_0, %c0_i32_1 : i32, i32, i32
  }
  func.func @transform_5(%arg0: i32, %arg1: i32, %arg2: i32) -> (i32, i32, i32) {
    %c0_i32 = arith.constant 0 : i32
    %c0_i32_0 = arith.constant 0 : i32
    return %arg0, %arg1, %c0_i32 : i32, i32, i32
  }
  func.func @transform_6(%arg0: i32, %arg1: i32, %arg2: i32) -> (i32, i32, i32) {
    %c0_i32 = arith.constant 0 : i32
    %c0_i32_0 = arith.constant 0 : i32
    return %arg0, %arg1, %c0_i32 : i32, i32, i32
  }
}

</mosaic_0001>

<bundles_post_ra>
// kernel: experts_forward.1
= control target key start
LH: loop header
LB: loop body
LE: loop exit
PB: predicated region body
PF: predicated region fallthrough
CT: control target
= control target key end

     0   :  { %s3803_s21 = smov 0   ;;  %s3805_s22 = smov 0   ;;  %s4723_s0 = inlined_call_operand.vmem [shape: bf16[2,256,256], index: 0, kind: input, shape index: {}]   ;;  %s4724_s1 = inlined_call_operand.vmem [shape: bf16[1,256,512], index: 1, kind: input, shape index: {}]   ;;  %s4725_s2 = inlined_call_operand.vmem [shape: f32[1,1,512], index: 2, kind: input, shape index: {}]   ;;  %s4726_s3 = inlined_call_operand.vmem [shape: bf16[1,512,256], index: 3, kind: input, shape index: {}]   ;;  %s4727_s4 = inlined_call_operand.vmem [shape: f32[1,1,256], index: 4, kind: input, shape index: {}]   ;;  %s4728_s5 = inlined_call_operand.vmem [shape: f32[2,256,1], index: 5, kind: input, shape index: {}]   ;;  %s4729_s6 = inlined_call_operand.vmem [shape: f32[2,256,256], index: 6, kind: output, shape index: {}]  }
   0x1   :  { %s3807_s23 = smov 0  }
   0x2 LB: > { %s35_s24 = sadd.s32 1, %s3761_s22  ;;  %p3240_p0 = scmp.ge.s32.totalorder %s3765_s23, 1  ;;  %s3765_s23 = sphi %s3807_s23, %s16_s23   ;;  %s3761_s22 = sphi %s3805_s22, %s4731_s22   ;;  %s3757_s21 = sphi %s3803_s21, %s4730_s21  }
   0x3   : > { %p37_p1 = scmp.ge.s32.totalorder %s35_s24, 2  ;;  %p291_p2 = scmp.lt.s32.totalorder %s3765_s23, 3 }
   0x5   : > { %s4733_s24 = smov (%p37_p1, %s35_s24), 0  ;;  %p292_p3 = pnand %p3240_p0, %p291_p2 }
   0x6   : > { %v3503_v0 = vld [vmem:[%s4724_s1 + $0x4] ss:$16 sps:$4 sm:$0xff] (!%p292_p3)   ;;  %v3505_v1 = vld [vmem:[%s4724_s1] ss:$16 sps:$4 sm:$0xff] (!%p292_p3)   ;;  %p356_p4 = scmp.lt.s32.totalorder (!%p292_p3), %s3757_s21, 1 }
   0x7   : > { %295 = sbr.rel (%p292_p3) target bundleno = 761 (0x2f9), region = 44  ;;  %1071 = vmatprep.subr.bf16.mxu1 (!%p292_p3), %v3503_v0  ;;  %v3506_v2 = vld [vmem:[%s4724_s1 + $0x24] ss:$16 sps:$4 sm:$0xff] (!%p292_p3)   ;;  %v3508_v3 = vld [vmem:[%s4724_s1 + $0x20] ss:$16 sps:$4 sm:$0xff] (!%p292_p3)  }
   0x8   : > { %1072 = vmatpush1.bf16.msra.mxu1 (!%p292_p3), %v3505_v1  ;;  %v3509_v4 = vld [vmem:[%s4724_s1 + $0x44] ss:$16 sps:$4 sm:$0xff] (!%p292_p3)   ;;  %v3511_v5 = vld [vmem:[%s4724_s1 + $0x40] ss:$16 sps:$4 sm:$0xff] (!%p292_p3)   ;;  %v3556_v33 = vld [vmem:[%s4724_s1 + $0xc] ss:$16 sps:$4 sm:$0xff] (!%p292_p3)  }
   0x9   : > { %1073 = vmatprep.subr.bf16.mxu1 (!%p292_p3), %v3506_v2  ;;  %v3512_v6 = vld [vmem:[%s4724_s1 + $0x64] ss:$16 sps:$4 sm:$0xff] (!%p292_p3)   ;;  %v3514_v7 = vld [vmem:[%s4724_s1 + $0x60] ss:$16 sps:$4 sm:$0xff] (!%p292_p3)   ;;  %v3554_v35 = vld [vmem:[%s4724_s1 + $0x8] ss:$16 sps:$4 sm:$0xff] (!%p292_p3)  }
   0xa   : > { %v3515_v8 = vld [vmem:[%s4724_s1 + $0x84] ss:$16 sps:$4 sm:$0xff] (!%p292_p3)   ;;  %v3517_v9 = vld [vmem:[%s4724_s1 + $0x80] ss:$16 sps:$4 sm:$0xff] (!%p292_p3)   ;;  %v3562_v37 = vld [vmem:[%s4724_s1 + $0x2c] ss:$16 sps:$4 sm:$0xff] (!%p292_p3)  }
   0xb   : > { %v3518_v10 = vld [vmem:[%s4724_s1 + $0xa4] ss:$16 sps:$4 sm:$0xff] (!%p292_p3)   ;;  %v3520_v11 = vld [vmem:[%s4724_s1 + $0xa0] ss:$16 sps:$4 sm:$0xff] (!%p292_p3)   ;;  %v3560_v38 = vld [vmem:[%s4724_s1 + $0x28] ss:$16 sps:$4 sm:$0xff] (!%p292_p3)  }
   0xc   : > { %1074 = vmatpush1.bf16.msra.mxu1 (!%p292_p3), %v3508_v3  ;;  %v3521_v12 = vld [vmem:[%s4724_s1 + $0xc4] ss:$16 sps:$4 sm:$0xff] (!%p292_p3)   ;;  %v3523_v14 = vld [vmem:[%s4724_s1 + $0xc0] ss:$16 sps:$4 sm:$0xff] (!%p292_p3)   ;;  %v3568_v39 = vld [vmem:[%s4724_s1 + $0x4c] ss:$16 sps:$4 sm:$0xff] (!%p292_p3)  }
   0xd   : > { %1075 = vmatprep.subr.bf16.mxu1 (!%p292_p3), %v3509_v4  ;;  %v3524_v15 = vld [vmem:[%s4724_s1 + $0xe4] ss:$16 sps:$4 sm:$0xff] (!%p292_p3)   ;;  %v3526_v16 = vld [vmem:[%s4724_s1 + $0xe0] ss:$16 sps:$4 sm:$0xff] (!%p292_p3)   ;;  %v3566_v42 = vld [vmem:[%s4724_s1 + $0x48] ss:$16 sps:$4 sm:$0xff] (!%p292_p3)  }
   0xe   : > { %s4735_s21 = smov (!%p356_p4, %s3757_s21), 1  ;;  %v3527_v17 = vld [vmem:[%s4724_s1 + $0x104] ss:$16 sps:$4 sm:$0xff]   ;;  %v3529_v18 = vld [vmem:[%s4724_s1 + $0x100] ss:$16 sps:$4 sm:$0xff]  }
   0xf   : > { %s3409_s27 = sshll.u32 %s4735_s21, 8  ;;  %v3530_v19 = vld [vmem:[%s4724_s1 + $0x124] ss:$16 sps:$4 sm:$0xff]   ;;  %v3532_v20 = vld [vmem:[%s4724_s1 + $0x120] ss:$16 sps:$4 sm:$0xff]   ;;  %s3411_s9 = sshll.u32 %s4735_s21, 9 }
  0x10   : > { %1076 = vmatpush1.bf16.msra.mxu1 %v3511_v5  ;;  %s3865_s8 = scalar_lea.vmem %s4723_s0, %s3409_s27  ;;  %v3533_v21 = vld [vmem:[%s4724_s1 + $0x144] ss:$16 sps:$4 sm:$0xff]   ;;  %v3535_v22 = vld [vmem:[%s4724_s1 + $0x140] ss:$16 sps:$4 sm:$0xff]   ;;  %v3574_v43 = vld [vmem:[%s4724_s1 + $0x6c] ss:$16 sps:$4 sm:$0xff]   ;;  %s4447_s30 = scalar_lea.vmem %s4728_s5, %s3409_s27 }
  0x11   : > { %1077 = vmatprep.subr.bf16.mxu1 %v3512_v6  ;;  %v3871_v13 = vld [vmem:[%s3865_s8 + $0x4] ss:$8 sps:$4 sm:$0xff]   ;;  %v3538_v24 = vld [vmem:[%s4724_s1 + $0x160] ss:$16 sps:$4 sm:$0xff]   ;;  %v3941_v36 = vld [vmem:[%s3865_s8 + $0x14] ss:$8 sps:$4 sm:$0xff]   ;;  %s4585_s12 = scalar_lea.vmem %s4729_s6, %s3411_s9 }
  0x12   : > { %1103 = vmatprep.mubr.bf16.mxu1 %v3871_v13  ;;  %v3536_v23 = vld [vmem:[%s4724_s1 + $0x164] ss:$16 sps:$4 sm:$0xff]   ;;  %v3541_v26 = vld [vmem:[%s4724_s1 + $0x180] ss:$16 sps:$4 sm:$0xff]   ;;  %v3572_v44 = vld [vmem:[%s4724_s1 + $0x68] ss:$16 sps:$4 sm:$0xff]  }
  0x13   : > { %v3539_v25 = vld [vmem:[%s4724_s1 + $0x184] ss:$16 sps:$4 sm:$0xff]   ;;  %v3544_v28 = vld [vmem:[%s4724_s1 + $0x1a0] ss:$16 sps:$4 sm:$0xff]   ;;  %v3580_v45 = vld [vmem:[%s4724_s1 + $0x8c] ss:$16 sps:$4 sm:$0xff]  }
  0x14   : > { %1078 = vmatpush1.bf16.msra.mxu1 %v3514_v7  ;;  %v3542_v27 = vld [vmem:[%s4724_s1 + $0x1a4] ss:$16 sps:$4 sm:$0xff]   ;;  %v3547_v30 = vld [vmem:[%s4724_s1 + $0x1c0] ss:$16 sps:$4 sm:$0xff]   ;;  %v3578_v48 = vld [vmem:[%s4724_s1 + $0x88] ss:$16 sps:$4 sm:$0xff]  }
  0x15   : > { %1079 = vmatprep.subr.bf16.mxu1 %v3515_v8  ;;  %v3545_v29 = vld [vmem:[%s4724_s1 + $0x1c4] ss:$16 sps:$4 sm:$0xff]   ;;  %v3550_v32 = vld [vmem:[%s4724_s1 + $0x1e0] ss:$16 sps:$4 sm:$0xff]   ;;  %v3586_v49 = vld [vmem:[%s4724_s1 + $0xac] ss:$16 sps:$4 sm:$0xff]  }
  0x16   : > { %v3548_v31 = vld [vmem:[%s4724_s1 + $0x1e4] ss:$16 sps:$4 sm:$0xff]   ;;  %v3935_v34 = vld [vmem:[%s3865_s8] ss:$8 sps:$4 sm:$0xff]   ;;  %v3955_v40 = vld [vmem:[%s3865_s8 + $0x10] ss:$8 sps:$4 sm:$0xff]  }
  0x17   : > { %v3958_v41 = vld [vmem:[%s3865_s8 + $0x24] ss:$8 sps:$4 sm:$0xff]   ;;  %v3975_v46 = vld [vmem:[%s3865_s8 + $0x20] ss:$8 sps:$4 sm:$0xff]   ;;  %v3978_v47 = vld [vmem:[%s3865_s8 + $0x34] ss:$8 sps:$4 sm:$0xff]  }
  0x18   : > { %1080 = vmatpush1.bf16.msra.mxu1 %v3517_v9  ;;  %v3584_v50 = vld [vmem:[%s4724_s1 + $0xa8] ss:$16 sps:$4 sm:$0xff]   ;;  %v3592_v51 = vld [vmem:[%s4724_s1 + $0xcc] ss:$16 sps:$4 sm:$0xff]  }
  0x19   : > { %1081 = vmatprep.subr.bf16.mxu1 %v3518_v10  ;;  %v3995_v52 = vld [vmem:[%s3865_s8 + $0x30] ss:$8 sps:$4 sm:$0xff]   ;;  %v3998_v53 = vld [vmem:[%s3865_s8 + $0x44] ss:$8 sps:$4 sm:$0xff]   ;;  %v3649_v58 = vld [vmem:[%s4726_s3] ss:$8 sps:$4 sm:$0xff]  }
  0x1a   : > { %v3590_v54 = vld [vmem:[%s4724_s1 + $0xc8] ss:$16 sps:$4 sm:$0xff]   ;;  %v3598_v55 = vld [vmem:[%s4724_s1 + $0xec] ss:$16 sps:$4 sm:$0xff]  }
  0x1b   : > { %v3647_v56 = vld [vmem:[%s4726_s3 + $0x4] ss:$8 sps:$4 sm:$0xff]   ;;  %v3596_v57 = vld [vmem:[%s4724_s1 + $0xe8] ss:$16 sps:$4 sm:$0xff]   ;;  %v4024_v61 = vld [vmem:[%s3865_s8 + $0x54] ss:$8 sps:$4 sm:$0xff]  }
  0x1c   : > { %1082 = vmatpush1.bf16.msra.mxu1 %v3520_v11  ;;  %v3604_v59 = vld [vmem:[%s4724_s1 + $0x10c] ss:$16 sps:$4 sm:$0xff]   ;;  %2097 = vmatprep.subr.bf16.mxu0 %v3647_v56  ;;  %v4021_v60 = vld [vmem:[%s3865_s8 + $0x40] ss:$8 sps:$4 sm:$0xff]   ;;  %v3652_v1 = vld [vmem:[%s4726_s3 + $0x10] ss:$8 sps:$4 sm:$0xff]  }
  0x1d   : > { %1083 = vmatprep.subr.bf16.mxu1 %v3521_v12  ;;  %2098 = vmatpush1.bf16.msra.mxu0 %v3649_v58  ;;  %v3602_v62 = vld [vmem:[%s4724_s1 + $0x108] ss:$16 sps:$4 sm:$0xff]   ;;  %v3610_v63 = vld [vmem:[%s4724_s1 + $0x12c] ss:$16 sps:$4 sm:$0xff]  }
  0x1e   : > { %v3650_v0 = vld [vmem:[%s4726_s3 + $0x14] ss:$8 sps:$4 sm:$0xff]   ;;  %v3653_v2 = vld [vmem:[%s4726_s3 + $0x24] ss:$8 sps:$4 sm:$0xff]   ;;  %v3608_v3 = vld [vmem:[%s4724_s1 + $0x128] ss:$16 sps:$4 sm:$0xff]  }
  0x1f   : > { %v3616_v4 = vld [vmem:[%s4724_s1 + $0x14c] ss:$16 sps:$4 sm:$0xff]   ;;  %2099 = vmatprep.subr.bf16.mxu0 %v3650_v0  ;;  %v3655_v5 = vld [vmem:[%s4726_s3 + $0x20] ss:$8 sps:$4 sm:$0xff]   ;;  %v4053_v6 = vld [vmem:[%s3865_s8 + $0x50] ss:$8 sps:$4 sm:$0xff]  }
  0x20   : > { %1084 = vmatpush1.bf16.msra.mxu1 %v3523_v14  ;;  %v4056_v7 = vld [vmem:[%s3865_s8 + $0x64] ss:$8 sps:$4 sm:$0xff]   ;;  %v3614_v8 = vld [vmem:[%s4724_s1 + $0x148] ss:$16 sps:$4 sm:$0xff]   ;;  %v3656_v10 = vld [vmem:[%s4726_s3 + $0x34] ss:$8 sps:$4 sm:$0xff]  }
  0x21   : > { %1085 = vmatprep.subr.bf16.mxu1 %v3524_v15  ;;  %2100 = vmatpush1.bf16.msra.mxu0 %v3652_v1  ;;  %v3622_v9 = vld [vmem:[%s4724_s1 + $0x16c] ss:$16 sps:$4 sm:$0xff]   ;;  %v3658_v11 = vld [vmem:[%s4726_s3 + $0x30] ss:$8 sps:$4 sm:$0xff]   ;;  %v4186_v56 = vld [vmem:[%s3865_s8 + $0xa0] ss:$8 sps:$4 sm:$0xff]  }
  0x22   : > { %2101 = vmatprep.subr.bf16.mxu0 %v3653_v2  ;;  %v3659_v12 = vld [vmem:[%s4726_s3 + $0x44] ss:$8 sps:$4 sm:$0xff]   ;;  %v3620_v14 = vld [vmem:[%s4724_s1 + $0x168] ss:$16 sps:$4 sm:$0xff]   ;;  %v3686_v58 = vld [vmem:[%s4726_s3 + $0xd4] ss:$8 sps:$4 sm:$0xff]  }
  0x23   : > { %v3628_v15 = vld [vmem:[%s4724_s1 + $0x18c] ss:$16 sps:$4 sm:$0xff]   ;;  %v3691_v1 = vld [vmem:[%s4726_s3 + $0xe0] ss:$8 sps:$4 sm:$0xff]  }
  0x24   : > { %1086 = vmatpush1.bf16.msra.mxu1 %v3526_v16  ;;  %v3661_v16 = vld [vmem:[%s4726_s3 + $0x40] ss:$8 sps:$4 sm:$0xff]   ;;  %v4206_v0 = vld [vmem:[%s3865_s8 + $0xc4] ss:$8 sps:$4 sm:$0xff]   ;;  %v3692_v2 = vld [vmem:[%s4726_s3 + $0xf4] ss:$8 sps:$4 sm:$0xff]  }
  0x25   : > { %1087 = vmatprep.subr.bf16.mxu1 %v3527_v17  ;;  %2102 = vmatpush1.bf16.msra.mxu0 %v3655_v5  ;;  %v4085_v17 = vld [vmem:[%s3865_s8 + $0x60] ss:$8 sps:$4 sm:$0xff]   ;;  %v4223_v5 = vld [vmem:[%s3865_s8 + $0xd4] ss:$8 sps:$4 sm:$0xff]  }
  0x26   : > { %2103 = vmatprep.subr.bf16.mxu0 %v3656_v10  ;;  %v4234_v10 = vld [vmem:[%s3865_s8 + $0xe4] ss:$8 sps:$4 sm:$0xff]  }
  0x28   : > { %1088 = vmatpush1.bf16.msra.mxu1 %v3529_v18  ;;  %v4088_v18 = vld [vmem:[%s3865_s8 + $0x74] ss:$8 sps:$4 sm:$0xff]  }
  0x29   : > { %1089 = vmatprep.subr.bf16.mxu1 %v3530_v19  ;;  %2104 = vmatpush1.bf16.msra.mxu0 %v3658_v11  ;;  %v3626_v19 = vld [vmem:[%s4724_s1 + $0x188] ss:$16 sps:$4 sm:$0xff]  }
  0x2a   : > { %2105 = vmatprep.subr.bf16.mxu0 %v3659_v12  ;;  %v4239_v11 = vld [vmem:[%s3865_s8 + $0xe0] ss:$8 sps:$4 sm:$0xff]   ;;  %v4242_v12 = vld [vmem:[%s3865_s8 + $0xf4] ss:$8 sps:$4 sm:$0xff]  }
  0x2c   : > { %1090 = vmatpush1.bf16.msra.mxu1 %v3532_v20  ;;  %v3634_v20 = vld [vmem:[%s4724_s1 + $0x1ac] ss:$16 sps:$4 sm:$0xff]  }
  0x2d   : > { %1091 = vmatprep.subr.bf16.mxu1 %v3533_v21  ;;  %2106 = vmatpush1.bf16.msra.mxu0 %v3661_v16  ;;  %v3662_v21 = vld [vmem:[%s4726_s3 + $0x54] ss:$8 sps:$4 sm:$0xff]  }
  0x2e   : > { %2107 = vmatprep.subr.bf16.mxu0 %v3662_v21 }
  0x30   : > { %1092 = vmatpush1.bf16.msra.mxu1 %v3535_v22  ;;  %v3664_v22 = vld [vmem:[%s4726_s3 + $0x50] ss:$8 sps:$4 sm:$0xff]  }
  0x31   : > { %1093 = vmatprep.subr.bf16.mxu1 %v3536_v23  ;;  %v3665_v23 = vld [vmem:[%s4726_s3 + $0x64] ss:$8 sps:$4 sm:$0xff]   ;;  %2108 = vmatpush1.bf16.msra.mxu0 %v3664_v22 }
  0x32   : > { %2109 = vmatprep.subr.bf16.mxu0 %v3665_v23 }
  0x34   : > { %1094 = vmatpush1.bf16.msra.mxu1 %v3538_v24  ;;  %v3632_v24 = vld [vmem:[%s4724_s1 + $0x1a8] ss:$16 sps:$4 sm:$0xff]  }
  0x35   : > { %1095 = vmatprep.subr.bf16.mxu1 %v3539_v25  ;;  %v3640_v25 = vld [vmem:[%s4724_s1 + $0x1cc] ss:$16 sps:$4 sm:$0xff]  }
  0x38   : > { %1096 = vmatpush1.bf16.msra.mxu1 %v3541_v26  ;;  %v3667_v26 = vld [vmem:[%s4726_s3 + $0x60] ss:$8 sps:$4 sm:$0xff]  }
  0x39   : > { %1097 = vmatprep.subr.bf16.mxu1 %v3542_v27  ;;  %v4117_v27 = vld [vmem:[%s3865_s8 + $0x70] ss:$8 sps:$4 sm:$0xff]   ;;  %2110 = vmatpush1.bf16.msra.mxu0 %v3667_v26 }
  0x3c   : > { %1098 = vmatpush1.bf16.msra.mxu1 %v3544_v28  ;;  %v4120_v28 = vld [vmem:[%s3865_s8 + $0x84] ss:$8 sps:$4 sm:$0xff]  }
  0x3d   : > { %1099 = vmatprep.subr.bf16.mxu1 %v3545_v29  ;;  %v3638_v29 = vld [vmem:[%s4724_s1 + $0x1c8] ss:$16 sps:$4 sm:$0xff]  }
  0x40   : > { %1100 = vmatpush1.bf16.msra.mxu1 %v3547_v30  ;;  %v3646_v30 = vld [vmem:[%s4724_s1 + $0x1ec] ss:$16 sps:$4 sm:$0xff]  }
  0x41   : > { %1101 = vmatprep.subr.bf16.mxu1 %v3548_v31  ;;  %v3668_v31 = vld [vmem:[%s4726_s3 + $0x74] ss:$8 sps:$4 sm:$0xff]  }
  0x42   : > { %2111 = vmatprep.subr.bf16.mxu0 %v3668_v31 }
  0x44   : > { %1102 = vmatpush1.bf16.msra.mxu1 %v3550_v32  ;;  %v3670_v32 = vld [vmem:[%s4726_s3 + $0x70] ss:$8 sps:$4 sm:$0xff]  }
  0x45   : > { %1264 = vmatprep.subr.bf16.mxu1 %v3556_v33  ;;  %v3671_v33 = vld [vmem:[%s4726_s3 + $0x84] ss:$8 sps:$4 sm:$0xff]   ;;  %2112 = vmatpush1.bf16.msra.mxu0 %v3670_v32 }
  0x46   : > { %2113 = vmatprep.subr.bf16.mxu0 %v3671_v33  ;;  %v3698_v33 = vld [vmem:[%s4726_s3 + $0x110] ss:$8 sps:$4 sm:$0xff]  }
  0x47   : > { %1104 = vmatmul.mubr.bf16.vlgmr.msra.gmra.mrb[0].mxu1 %v3935_v34 }
  0x48   : > { %1265 = vmatpush1.bf16.msra.mxu1 %v3554_v35  ;;  %1113 = vmatprep.mubr.bf16.mxu1 %v3941_v36  ;;  %v3644_v35 = vld [vmem:[%s4724_s1 + $0x1e8] ss:$16 sps:$4 sm:$0xff]  }
  0x49   : > { %1266 = vmatprep.subr.bf16.mxu1 %v3562_v37  ;;  %v3673_v37 = vld [vmem:[%s4726_s3 + $0x80] ss:$8 sps:$4 sm:$0xff]  }
  0x4a   : > { %2114 = vmatpush1.bf16.msra.mxu0 %v3673_v37 }
  0x4c   : > { %1267 = vmatpush1.bf16.msra.mxu1 %v3560_v38  ;;  %v4146_v38 = vld [vmem:[%s3865_s8 + $0x80] ss:$8 sps:$4 sm:$0xff]  }
  0x4d   : > { %1268 = vmatprep.subr.bf16.mxu1 %v3568_v39  ;;  %v4149_v39 = vld [vmem:[%s3865_s8 + $0x94] ss:$8 sps:$4 sm:$0xff]  }
  0x4f   : > { %1114 = vmatmul.mubr.bf16.gmra.mrb[4].mxu1 %v3955_v40 }
  0x50   : > { %1123 = vmatprep.mubr.bf16.mxu1 %v3958_v41  ;;  %1269 = vmatpush1.bf16.msra.mxu1 %v3566_v42  ;;  %v3674_v42 = vld [vmem:[%s4726_s3 + $0x94] ss:$8 sps:$4 sm:$0xff]  }
  0x51   : > { %1270 = vmatprep.subr.bf16.mxu1 %v3574_v43  ;;  %v3676_v43 = vld [vmem:[%s4726_s3 + $0x90] ss:$8 sps:$4 sm:$0xff]   ;;  %2115 = vmatprep.subr.bf16.mxu0 %v3674_v42 }
  0x52   : > { %2116 = vmatpush1.bf16.msra.mxu0 %v3676_v43 }
  0x54   : > { %1271 = vmatpush1.bf16.msra.mxu1 %v3572_v44  ;;  %v3677_v44 = vld [vmem:[%s4726_s3 + $0xa4] ss:$8 sps:$4 sm:$0xff]  }
  0x55   : > { %1272 = vmatprep.subr.bf16.mxu1 %v3580_v45  ;;  %v3679_v45 = vld [vmem:[%s4726_s3 + $0xa0] ss:$8 sps:$4 sm:$0xff]   ;;  %2117 = vmatprep.subr.bf16.mxu0 %v3677_v44 }
  0x56   : > { %2118 = vmatpush1.bf16.msra.mxu0 %v3679_v45 }
  0x57   : > { %1124 = vmatmul.mubr.bf16.gmra.mrb[8].mxu1 %v3975_v46 }
  0x58   : > { %1133 = vmatprep.mubr.bf16.mxu1 %v3978_v47  ;;  %1273 = vmatpush1.bf16.msra.mxu1 %v3578_v48  ;;  %v4166_v48 = vld [vmem:[%s3865_s8 + $0x90] ss:$8 sps:$4 sm:$0xff]  }
  0x59   : > { %1274 = vmatprep.subr.bf16.mxu1 %v3586_v49  ;;  %v4169_v49 = vld [vmem:[%s3865_s8 + $0xa4] ss:$8 sps:$4 sm:$0xff]  }
  0x5c   : > { %1275 = vmatpush1.bf16.msra.mxu1 %v3584_v50  ;;  %v3680_v50 = vld [vmem:[%s4726_s3 + $0xb4] ss:$8 sps:$4 sm:$0xff]  }
  0x5d   : > { %1276 = vmatprep.subr.bf16.mxu1 %v3592_v51  ;;  %v3682_v51 = vld [vmem:[%s4726_s3 + $0xb0] ss:$8 sps:$4 sm:$0xff]   ;;  %2119 = vmatprep.subr.bf16.mxu0 %v3680_v50 }
  0x5e   : > { %2120 = vmatpush1.bf16.msra.mxu0 %v3682_v51  ;;  %v3706_v51 = vld [vmem:[%s4726_s3 + $0x134] ss:$8 sps:$4 sm:$0xff]  }
  0x5f   : > { %1134 = vmatmul.mubr.bf16.gmra.mrb[12].mxu1 %v3995_v52 }
  0x60   : > { %1143 = vmatprep.mubr.bf16.mxu1 %v3998_v53  ;;  %1277 = vmatpush1.bf16.msra.mxu1 %v3590_v54  ;;  %v3683_v54 = vld [vmem:[%s4726_s3 + $0xc4] ss:$8 sps:$4 sm:$0xff]  }
  0x61   : > { %1278 = vmatprep.subr.bf16.mxu1 %v3598_v55  ;;  %v3685_v55 = vld [vmem:[%s4726_s3 + $0xc0] ss:$8 sps:$4 sm:$0xff]   ;;  %2121 = vmatprep.subr.bf16.mxu0 %v3683_v54 }
  0x62   : > { %2122 = vmatpush1.bf16.msra.mxu0 %v3685_v55 }
  0x63   : > { %2123 = vmatprep.subr.bf16.mxu0 %v3686_v58 }
  0x64   : > { %1279 = vmatpush1.bf16.msra.mxu1 %v3596_v57  ;;  %v4189_v57 = vld [vmem:[%s3865_s8 + $0xb4] ss:$8 sps:$4 sm:$0xff]  }
  0x65   : > { %1280 = vmatprep.subr.bf16.mxu1 %v3604_v59  ;;  %v3688_v59 = vld [vmem:[%s4726_s3 + $0xd0] ss:$8 sps:$4 sm:$0xff]  }
  0x66   : > { %2124 = vmatpush1.bf16.msra.mxu0 %v3688_v59  ;;  %v3704_v59 = vld [vmem:[%s4726_s3 + $0x130] ss:$8 sps:$4 sm:$0xff]  }
  0x67   : > { %1144 = vmatmul.mubr.bf16.gmra.mrb[16].mxu1 %v4021_v60 }
  0x68   : > { %1153 = vmatprep.mubr.bf16.mxu1 %v4024_v61  ;;  %1281 = vmatpush1.bf16.msra.mxu1 %v3602_v62  ;;  %v4200_v62 = vld [vmem:[%s3865_s8 + $0xb0] ss:$8 sps:$4 sm:$0xff]  }
  0x69   : > { %1282 = vmatprep.subr.bf16.mxu1 %v3610_v63  ;;  %v3689_v63 = vld [vmem:[%s4726_s3 + $0xe4] ss:$8 sps:$4 sm:$0xff]  }
  0x6a   : > { %2125 = vmatprep.subr.bf16.mxu0 %v3689_v63 }
  0x6b   : > { %2126 = vmatpush1.bf16.msra.mxu0 %v3691_v1 }
  0x6c   : > { %1283 = vmatpush1.bf16.msra.mxu1 %v3608_v3  ;;  %v3694_v3 = vld [vmem:[%s4726_s3 + $0xf0] ss:$8 sps:$4 sm:$0xff]   ;;  %2127 = vmatprep.subr.bf16.mxu0 %v3692_v2 }
  0x6d   : > { %1284 = vmatprep.subr.bf16.mxu1 %v3616_v4  ;;  %v4220_v4 = vld [vmem:[%s3865_s8 + $0xc0] ss:$8 sps:$4 sm:$0xff]  }
  0x6f   : > { %1154 = vmatmul.mubr.bf16.gmra.mrb[20].mxu1 %v4053_v6  ;;  %2128 = vmatpush1.bf16.msra.mxu0 %v3694_v3 }
  0x70   : > { %1163 = vmatprep.mubr.bf16.mxu1 %v4056_v7  ;;  %1285 = vmatpush1.bf16.msra.mxu1 %v3614_v8  ;;  %v3697_v8 = vld [vmem:[%s4726_s3 + $0x104] ss:$8 sps:$4 sm:$0xff]  }
  0x71   : > { %1286 = vmatprep.subr.bf16.mxu1 %v3622_v9  ;;  %v4231_v9 = vld [vmem:[%s3865_s8 + $0xd0] ss:$8 sps:$4 sm:$0xff]   ;;  %2290 = vmatprep.subr.bf16.mxu0 %v3697_v8  ;;  %v3707_v8 = vld [vmem:[%s4726_s3 + $0x140] ss:$8 sps:$4 sm:$0xff]  }
  0x74   : > { %1287 = vmatpush1.bf16.msra.mxu1 %v3620_v14  ;;  %v4247_v14 = vld [vmem:[%s3865_s8 + $0xf0] ss:$8 sps:$4 sm:$0xff]  }
  0x75   : > { %1288 = vmatprep.subr.bf16.mxu1 %v3628_v15 }
  0x77   : > { %1164 = vmatmul.mubr.bf16.gmra.mrb[24].mxu1 %v4085_v17 }
  0x78   : > { %1173 = vmatprep.mubr.bf16.mxu1 %v4088_v18  ;;  %1289 = vmatpush1.bf16.msra.mxu1 %v3626_v19 }
  0x79   : > { %1290 = vmatprep.subr.bf16.mxu1 %v3634_v20 }
  0x7c   : > { %1291 = vmatpush1.bf16.msra.mxu1 %v3632_v24  ;;  %v3695_v24 = vld [vmem:[%s4726_s3 + $0x100] ss:$8 sps:$4 sm:$0xff]  }
  0x7d   : > { %1292 = vmatprep.subr.bf16.mxu1 %v3640_v25 }
  0x7f   : > { %1174 = vmatmul.mubr.bf16.gmra.mrb[28].mxu1 %v4117_v27 }
  0x80   : > { %1183 = vmatprep.mubr.bf16.mxu1 %v4120_v28  ;;  %1293 = vmatpush1.bf16.msra.mxu1 %v3638_v29 }
  0x81   : > { %1294 = vmatprep.subr.bf16.mxu1 %v3646_v30 }
  0x84   : > { %1295 = vmatpush1.bf16.msra.mxu1 %v3644_v35 }
  0x87   : > { %1184 = vmatmul.mubr.bf16.gmra.mrb[32].mxu1 %v4146_v38 }
  0x88   : > { %1193 = vmatprep.mubr.bf16.mxu1 %v4149_v39 }
  0x8f   : > { %1194 = vmatmul.mubr.bf16.gmra.mrb[36].mxu1 %v4166_v48 }
  0x90   : > { %1203 = vmatprep.mubr.bf16.mxu1 %v4169_v49 }
  0x97   : > { %1204 = vmatmul.mubr.bf16.gmra.mrb[40].mxu1 %v4186_v56 }
  0x98   : > { %1213 = vmatprep.mubr.bf16.mxu1 %v4189_v57 }
  0x9f   : > { %1214 = vmatmul.mubr.bf16.gmra.mrb[44].mxu1 %v4200_v62 }
  0xa0   : > { %1223 = vmatprep.mubr.bf16.mxu1 %v4206_v0 }
  0xa7   : > { %1224 = vmatmul.mubr.bf16.gmra.mrb[48].mxu1 %v4220_v4 }
  0xa8   : > { %1233 = vmatprep.mubr.bf16.mxu1 %v4223_v5 }
  0xaf   : > { %1234 = vmatmul.mubr.bf16.gmra.mrb[52].mxu1 %v4231_v9 }
  0xb0   : > { %1243 = vmatprep.mubr.bf16.mxu1 %v4234_v10 }
  0xb7   : > { %1244 = vmatmul.mubr.bf16.gmra.mrb[56].mxu1 %v4239_v11 }
  0xb8   : > { %1253 = vmatprep.mubr.bf16.mxu1 %v4242_v12 }
  0xbf   : > { %1254 = vmatmul.mubr.bf16.gmra.mrb[60].mxu1 %v4247_v14 }
  0xc0   : > { %1296 = vmatprep.mubr.bf16.mxu1 %v3871_v13  ;;  %v571_v13 = vlaneseq }
  0xc7   : > { %1297 = vmatmul.mubr.bf16.vlgmr.msra.gmra.mrb[64].mxu1 %v3935_v34  ;;  %v4270_v34 = vshrl.u32 %v571_v13, 7 }
  0xc8   : > { %1306 = vmatprep.mubr.bf16.mxu1 %v3941_v36 }
  0xc9   : > { %v573_v36 = vsub.s32 0, %v4270_v34 }
  0xcf   : > { %1307 = vmatmul.mubr.bf16.gmra.mrb[68].mxu1 %v3955_v40  ;;  %v4277_v40 = vld [vmem:[%s4725_s2] sm:$0xf] }
  0xd0   : > { %1316 = vmatprep.mubr.bf16.mxu1 %v3958_v41  ;;  %v577_v41 = vsub.s32 1, %v4270_v34 }
  0xd7   : > { %1317 = vmatmul.mubr.bf16.gmra.mrb[72].mxu1 %v3975_v46  ;;  %v4284_v46 = vrot.slane %v4277_v40, %v573_v36 }
  0xd8   : > { %1326 = vmatprep.mubr.bf16.mxu1 %v3978_v47  ;;  %v4289_v47 = vrot.slane %v4277_v40, %v577_v41 }
  0xdf   : > { %1327 = vmatmul.mubr.bf16.gmra.mrb[76].mxu1 %v3995_v52 }
  0xe0   : > { %1336 = vmatprep.mubr.bf16.mxu1 %v3998_v53 }
  0xe7   : > { %1337 = vmatmul.mubr.bf16.gmra.mrb[80].mxu1 %v4021_v60 }
  0xe8   : > { %1346 = vmatprep.mubr.bf16.mxu1 %v4024_v61 }
  0xef   : > { %1347 = vmatmul.mubr.bf16.gmra.mrb[84].mxu1 %v4053_v6 }
  0xf0   : > { %1356 = vmatprep.mubr.bf16.mxu1 %v4056_v7 }
  0xf7   : > { %1357 = vmatmul.mubr.bf16.gmra.mrb[88].mxu1 %v4085_v17 }
  0xf8   : > { %1366 = vmatprep.mubr.bf16.mxu1 %v4088_v18 }
  0xff   : > { %1367 = vmatmul.mubr.bf16.gmra.mrb[92].mxu1 %v4117_v27  ;;  %v3700_v27 = vld [vmem:[%s4726_s3 + $0x114] ss:$8 sps:$4 sm:$0xff]  }
 0x100   : > { %1376 = vmatprep.mubr.bf16.mxu1 %v4120_v28 }
 0x107   : > { %1377 = vmatmul.mubr.bf16.gmra.mrb[96].mxu1 %v4146_v38  ;;  %v3703_v38 = vld [vmem:[%s4726_s3 + $0x124] ss:$8 sps:$4 sm:$0xff]  }
 0x108   : > { %1386 = vmatprep.mubr.bf16.mxu1 %v4149_v39 }
 0x10f   : > { %1387 = vmatmul.mubr.bf16.gmra.mrb[100].mxu1 %v4166_v48  ;;  %v3701_v48 = vld [vmem:[%s4726_s3 + $0x120] ss:$8 sps:$4 sm:$0xff]  }
 0x110   : > { %1396 = vmatprep.mubr.bf16.mxu1 %v4169_v49 }
 0x117   : > { %1397 = vmatmul.mubr.bf16.gmra.mrb[104].mxu1 %v4186_v56 }
 0x118   : > { %1406 = vmatprep.mubr.bf16.mxu1 %v4189_v57 }
 0x11a   : > { %v1105_v52 = vpop.f32.mrb[0].mxu1 }
 0x11b   : > { %v1106_v53 = vadd.f32 %v1105_v52, %v4284_v46  ;;  %v1107_v60 = vpop.f32.mrb[1].mxu1  ;;  %v3712_v52 = vld [vmem:[%s4726_s3 + $0x154] ss:$8 sps:$4 sm:$0xff]  }
 0x11c   : > { %v1108_v61 = vadd.f32 %v1107_v60, %v4289_v47  ;;  %v1109_v6 = vpop.f32.mrb[2].mxu1 }
 0x11d   : > { %v1110_v7 = vadd.f32 %v1109_v6, %v4284_v46  ;;  %v1111_v15 = vpop.f32.mrb[3].mxu1  ;;  %v1457_v17 = vmax.f32 %v1106_v53, 0.0 }
 0x11e   : > { %v1112_v16 = vadd.f32 %v1111_v15, %v4289_v47  ;;  %v1458_v19 = vmax.f32 %v1108_v61, 0.0 }
 0x11f   : > { %v1461_v18 = vmax.f32 %v1110_v7, 0.0  ;;  %1407 = vmatmul.mubr.bf16.gmra.mrb[108].mxu1 %v4200_v62  ;;  %v3710_v7 = vld [vmem:[%s4726_s3 + $0x150] ss:$8 sps:$4 sm:$0xff]  }
 0x120   : > { %v1462_v20 = vmax.f32 %v1112_v16, 0.0  ;;  %1416 = vmatprep.mubr.bf16.mxu1 %v4206_v0  ;;  %v3709_v0 = vld [vmem:[%s4726_s3 + $0x144] ss:$8 sps:$4 sm:$0xff]  }
 0x121   : > { %v1585_v21 = vpack.c.bf16 %v1461_v18, %v1457_v17  ;;  %v3715_v17 = vld [vmem:[%s4726_s3 + $0x164] ss:$8 sps:$4 sm:$0xff]  }
 0x122   : > { %v1115_v22 = vpop.f32.mrb[4].mxu1  ;;  %v1586_v23 = vpack.c.bf16 %v1462_v20, %v1458_v19 }
 0x123   : > { %v1116_v25 = vadd.f32 %v1115_v22, %v4284_v46  ;;  %v1117_v26 = vpop.f32.mrb[5].mxu1 }
 0x124   : > { %v1118_v28 = vadd.f32 %v1117_v26, %v4289_v47  ;;  %v1119_v29 = vpop.f32.mrb[6].mxu1  ;;  %2129 = vmatprep.mubr.bf16.mxu0 %v1586_v23  ;;  %v3713_v23 = vld [vmem:[%s4726_s3 + $0x160] ss:$8 sps:$4 sm:$0xff]  }
 0x125   : > { %v1120_v30 = vadd.f32 %v1119_v29, %v4284_v46  ;;  %v1121_v31 = vpop.f32.mrb[7].mxu1  ;;  %2130 = vmatmul.mubr.bf16.vlgmr.msra.gmra.mrb[0].mxu0 %v1585_v21  ;;  %v1465_v35 = vmax.f32 %v1116_v25, 0.0  ;;  %v3718_v25 = vld [vmem:[%s4726_s3 + $0x174] ss:$8 sps:$4 sm:$0xff]  }
 0x126   : > { %v1122_v32 = vadd.f32 %v1121_v31, %v4289_v47  ;;  %2291 = vmatpush1.bf16.msra.mxu0 %v3695_v24  ;;  %v1466_v39 = vmax.f32 %v1118_v28, 0.0 }
 0x127   : > { %v1469_v37 = vmax.f32 %v1120_v30, 0.0  ;;  %1417 = vmatmul.mubr.bf16.gmra.mrb[112].mxu1 %v4220_v4  ;;  %2292 = vmatprep.subr.bf16.mxu0 %v3700_v27  ;;  %v3716_v30 = vld [vmem:[%s4726_s3 + $0x170] ss:$8 sps:$4 sm:$0xff]  }
 0x128   : > { %v1470_v42 = vmax.f32 %v1122_v32, 0.0  ;;  %1426 = vmatprep.mubr.bf16.mxu1 %v4223_v5 }
 0x129   : > { %v1589_v43 = vpack.c.bf16 %v1469_v37, %v1465_v35 }
 0x12a   : > { %v1590_v44 = vpack.c.bf16 %v1470_v42, %v1466_v39  ;;  %v1125_v45 = vpop.f32.mrb[8].mxu1  ;;  %2293 = vmatpush1.bf16.msra.mxu0 %v3698_v33  ;;  %v3721_v33 = vld [vmem:[%s4726_s3 + $0x184] ss:$8 sps:$4 sm:$0xff]  }
 0x12b   : > { %v1126_v49 = vadd.f32 %v1125_v45, %v4284_v46  ;;  %v1127_v50 = vpop.f32.mrb[9].mxu1  ;;  %2294 = vmatprep.subr.bf16.mxu0 %v3703_v38 }
 0x12c   : > { %v1128_v54 = vadd.f32 %v1127_v50, %v4289_v47  ;;  %v1129_v55 = vpop.f32.mrb[10].mxu1  ;;  %2139 = vmatprep.mubr.bf16.mxu0 %v1590_v44 }
 0x12d   : > { %v1130_v56 = vadd.f32 %v1129_v55, %v4284_v46  ;;  %v1131_v57 = vpop.f32.mrb[11].mxu1  ;;  %2140 = vmatmul.mubr.bf16.gmra.mrb[4].mxu0 %v1589_v43  ;;  %v1473_v62 = vmax.f32 %v1126_v49, 0.0  ;;  %v3719_v43 = vld [vmem:[%s4726_s3 + $0x180] ss:$8 sps:$4 sm:$0xff]   ;;  %v3722_v55 = vld [vmem:[%s4726_s3 + $0x190] ss:$8 sps:$4 sm:$0xff]  }
 0x12e   : > { %v1132_v58 = vadd.f32 %v1131_v57, %v4289_v47  ;;  %2295 = vmatpush1.bf16.msra.mxu0 %v3701_v48  ;;  %v1474_v1 = vmax.f32 %v1128_v54, 0.0 }
 0x12f   : > { %v1477_v63 = vmax.f32 %v1130_v56, 0.0  ;;  %1427 = vmatmul.mubr.bf16.gmra.mrb[116].mxu1 %v4231_v9  ;;  %2296 = vmatprep.subr.bf16.mxu0 %v3706_v51 }
 0x130   : > { %v1478_v2 = vmax.f32 %v1132_v58, 0.0  ;;  %1436 = vmatprep.mubr.bf16.mxu1 %v4234_v10  ;;  %v3727_v58 = vld [vmem:[%s4726_s3 + $0x1a4] ss:$8 sps:$4 sm:$0xff]  }
 0x131   : > { %v1593_v3 = vpack.c.bf16 %v1477_v63, %v1473_v62 }
 0x132   : > { %v1594_v4 = vpack.c.bf16 %v1478_v2, %v1474_v1  ;;  %v1135_v5 = vpop.f32.mrb[12].mxu1  ;;  %2297 = vmatpush1.bf16.msra.mxu0 %v3704_v59  ;;  %v3725_v2 = vld [vmem:[%s4726_s3 + $0x1a0] ss:$8 sps:$4 sm:$0xff]  }
 0x133   : > { %v1136_v13 = vadd.f32 %v1135_v5, %v4284_v46  ;;  %v1137_v9 = vpop.f32.mrb[13].mxu1  ;;  %2298 = vmatprep.subr.bf16.mxu0 %v3709_v0  ;;  %v3730_v5 = vld [vmem:[%s4726_s3 + $0x1b4] ss:$8 sps:$4 sm:$0xff]  }
 0x134   : > { %v1138_v53 = vadd.f32 %v1137_v9, %v4289_v47  ;;  %v1139_v60 = vpop.f32.mrb[14].mxu1  ;;  %2149 = vmatprep.mubr.bf16.mxu0 %v1594_v4 }
 0x135   : > { %v1140_v10 = vadd.f32 %v1139_v60, %v4284_v46  ;;  %v1141_v61 = vpop.f32.mrb[15].mxu1  ;;  %2150 = vmatmul.mubr.bf16.gmra.mrb[8].mxu0 %v1593_v3  ;;  %v1481_v15 = vmax.f32 %v1136_v13, 0.0  ;;  %v3728_v60 = vld [vmem:[%s4726_s3 + $0x1b0] ss:$8 sps:$4 sm:$0xff]  }
 0x136   : > { %v1142_v6 = vadd.f32 %v1141_v61, %v4289_v47  ;;  %2299 = vmatpush1.bf16.msra.mxu0 %v3707_v8  ;;  %v1482_v18 = vmax.f32 %v1138_v53, 0.0 }
 0x137   : > { %v1485_v16 = vmax.f32 %v1140_v10, 0.0  ;;  %1437 = vmatmul.mubr.bf16.gmra.mrb[120].mxu1 %v4239_v11  ;;  %2300 = vmatprep.subr.bf16.mxu0 %v3712_v52 }
 0x138   : > { %v1486_v19 = vmax.f32 %v1142_v6, 0.0  ;;  %1446 = vmatprep.mubr.bf16.mxu1 %v4242_v12  ;;  %v3733_v6 = vld [vmem:[%s4726_s3 + $0x1c4] ss:$8 sps:$4 sm:$0xff]  }
 0x139   : > { %v1597_v20 = vpack.c.bf16 %v1485_v16, %v1481_v15 }
 0x13a   : > { %v1598_v21 = vpack.c.bf16 %v1486_v19, %v1482_v18  ;;  %v1145_v22 = vpop.f32.mrb[16].mxu1  ;;  %2301 = vmatpush1.bf16.msra.mxu0 %v3710_v7  ;;  %v3731_v19 = vld [vmem:[%s4726_s3 + $0x1c0] ss:$8 sps:$4 sm:$0xff]  }
 0x13b   : > { %v1146_v24 = vadd.f32 %v1145_v22, %v4284_v46  ;;  %v1147_v11 = vpop.f32.mrb[17].mxu1  ;;  %2302 = vmatprep.subr.bf16.mxu0 %v3715_v17  ;;  %v3736_v22 = vld [vmem:[%s4726_s3 + $0x1d4] ss:$8 sps:$4 sm:$0xff]  }
 0x13c   : > { %v1148_v26 = vadd.f32 %v1147_v11, %v4289_v47  ;;  %v1149_v27 = vpop.f32.mrb[18].mxu1  ;;  %2159 = vmatprep.mubr.bf16.mxu0 %v1598_v21 }
 0x13d   : > { %v1150_v12 = vadd.f32 %v1149_v27, %v4284_v46  ;;  %v1151_v28 = vpop.f32.mrb[19].mxu1  ;;  %2160 = vmatmul.mubr.bf16.gmra.mrb[12].mxu0 %v1597_v20  ;;  %v1489_v31 = vmax.f32 %v1146_v24, 0.0  ;;  %v3734_v27 = vld [vmem:[%s4726_s3 + $0x1d0] ss:$8 sps:$4 sm:$0xff]  }
 0x13e   : > { %v1152_v29 = vadd.f32 %v1151_v28, %v4289_v47  ;;  %2303 = vmatpush1.bf16.msra.mxu0 %v3713_v23  ;;  %v1490_v35 = vmax.f32 %v1148_v26, 0.0 }
 0x13f   : > { %v1493_v32 = vmax.f32 %v1150_v12, 0.0  ;;  %1447 = vmatmul.mubr.bf16.gmra.mrb[124].mxu1 %v4247_v14  ;;  %2304 = vmatprep.subr.bf16.mxu0 %v3718_v25  ;;  %v3724_v14 = vld [vmem:[%s4726_s3 + $0x194] ss:$8 sps:$4 sm:$0xff]  }
 0x140   : > { %v1494_v37 = vmax.f32 %v1152_v29, 0.0  ;;  %v3739_v29 = vld [vmem:[%s4726_s3 + $0x1e4] ss:$8 sps:$4 sm:$0xff]  }
 0x141   : > { %v1601_v38 = vpack.c.bf16 %v1493_v32, %v1489_v31 }
 0x142   : > { %v1602_v39 = vpack.c.bf16 %v1494_v37, %v1490_v35  ;;  %v1155_v42 = vpop.f32.mrb[20].mxu1  ;;  %2305 = vmatpush1.bf16.msra.mxu0 %v3716_v30  ;;  %v3737_v37 = vld [vmem:[%s4726_s3 + $0x1e0] ss:$8 sps:$4 sm:$0xff]  }
 0x143   : > { %v1156_v44 = vadd.f32 %v1155_v42, %v4284_v46  ;;  %v1157_v45 = vpop.f32.mrb[21].mxu1  ;;  %2306 = vmatprep.subr.bf16.mxu0 %v3721_v33  ;;  %v3742_v42 = vld [vmem:[%s4726_s3 + $0x1f4] ss:$8 sps:$4 sm:$0xff]  }
 0x144   : > { %v1158_v48 = vadd.f32 %v1157_v45, %v4289_v47  ;;  %v1159_v49 = vpop.f32.mrb[22].mxu1  ;;  %2169 = vmatprep.mubr.bf16.mxu0 %v1602_v39 }
 0x145   : > { %v1160_v50 = vadd.f32 %v1159_v49, %v4284_v46  ;;  %v1161_v51 = vpop.f32.mrb[23].mxu1  ;;  %2170 = vmatmul.mubr.bf16.gmra.mrb[16].mxu0 %v1601_v38  ;;  %v1497_v56 = vmax.f32 %v1156_v44, 0.0  ;;  %v3740_v49 = vld [vmem:[%s4726_s3 + $0x1f0] ss:$8 sps:$4 sm:$0xff]  }
 0x146   : > { %v1162_v54 = vadd.f32 %v1161_v51, %v4289_v47  ;;  %2307 = vmatpush1.bf16.msra.mxu0 %v3719_v43  ;;  %v1498_v59 = vmax.f32 %v1158_v48, 0.0 }
 0x147   : > { %v1501_v57 = vmax.f32 %v1160_v50, 0.0  ;;  %2308 = vmatprep.subr.bf16.mxu0 %v3724_v14 }
 0x148   : > { %v1502_v62 = vmax.f32 %v1162_v54, 0.0 }
 0x149   : > { %v1605_v63 = vpack.c.bf16 %v1501_v57, %v1497_v56 }
 0x14a   : > { %v1606_v0 = vpack.c.bf16 %v1502_v62, %v1498_v59  ;;  %v1165_v1 = vpop.f32.mrb[24].mxu1  ;;  %2309 = vmatpush1.bf16.msra.mxu0 %v3722_v55 }
 0x14b   : > { %v1166_v3 = vadd.f32 %v1165_v1, %v4284_v46  ;;  %v1167_v4 = vpop.f32.mrb[25].mxu1  ;;  %2310 = vmatprep.subr.bf16.mxu0 %v3727_v58 }
 0x14c   : > { %v1168_v8 = vadd.f32 %v1167_v4, %v4289_v47  ;;  %v1169_v13 = vpop.f32.mrb[26].mxu1  ;;  %2179 = vmatprep.mubr.bf16.mxu0 %v1606_v0 }
 0x14d   : > { %v1170_v9 = vadd.f32 %v1169_v13, %v4284_v46  ;;  %v1171_v52 = vpop.f32.mrb[27].mxu1  ;;  %2180 = vmatmul.mubr.bf16.gmra.mrb[20].mxu0 %v1605_v63  ;;  %v1505_v10 = vmax.f32 %v1166_v3, 0.0 }
 0x14e   : > { %v1172_v53 = vadd.f32 %v1171_v52, %v4289_v47  ;;  %2311 = vmatpush1.bf16.msra.mxu0 %v3725_v2  ;;  %v1506_v7 = vmax.f32 %v1168_v8, 0.0 }
 0x14f   : > { %v1509_v61 = vmax.f32 %v1170_v9, 0.0  ;;  %2312 = vmatprep.subr.bf16.mxu0 %v3730_v5 }
 0x150   : > { %v1510_v15 = vmax.f32 %v1172_v53, 0.0 }
 0x151   : > { %v1609_v16 = vpack.c.bf16 %v1509_v61, %v1505_v10 }
 0x152   : > { %v1610_v17 = vpack.c.bf16 %v1510_v15, %v1506_v7  ;;  %v1175_v18 = vpop.f32.mrb[28].mxu1  ;;  %2313 = vmatpush1.bf16.msra.mxu0 %v3728_v60 }
 0x153   : > { %v1176_v20 = vadd.f32 %v1175_v18, %v4284_v46  ;;  %v1177_v21 = vpop.f32.mrb[29].mxu1  ;;  %2314 = vmatprep.subr.bf16.mxu0 %v3733_v6 }
 0x154   : > { %v1178_v23 = vadd.f32 %v1177_v21, %v4289_v47  ;;  %v1179_v24 = vpop.f32.mrb[30].mxu1  ;;  %2189 = vmatprep.mubr.bf16.mxu0 %v1610_v17 }
 0x155   : > { %v1180_v11 = vadd.f32 %v1179_v24, %v4284_v46  ;;  %v1181_v25 = vpop.f32.mrb[31].mxu1  ;;  %2190 = vmatmul.mubr.bf16.gmra.mrb[24].mxu0 %v1609_v16  ;;  %v1513_v12 = vmax.f32 %v1176_v20, 0.0 }
 0x156   : > { %v1182_v26 = vadd.f32 %v1181_v25, %v4289_v47  ;;  %2315 = vmatpush1.bf16.msra.mxu0 %v3731_v19  ;;  %v1514_v30 = vmax.f32 %v1178_v23, 0.0 }
 0x157   : > { %v1517_v28 = vmax.f32 %v1180_v11, 0.0  ;;  %2316 = vmatprep.subr.bf16.mxu0 %v3736_v22 }
 0x158   : > { %v1518_v31 = vmax.f32 %v1182_v26, 0.0 }
 0x159   : > { %v1613_v32 = vpack.c.bf16 %v1517_v28, %v1513_v12 }
 0x15a   : > { %v1614_v33 = vpack.c.bf16 %v1518_v31, %v1514_v30  ;;  %v1185_v35 = vpop.f32.mrb[32].mxu1  ;;  %2317 = vmatpush1.bf16.msra.mxu0 %v3734_v27 }
 0x15b   : > { %v1186_v38 = vadd.f32 %v1185_v35, %v4284_v46  ;;  %v1187_v39 = vpop.f32.mrb[33].mxu1  ;;  %2318 = vmatprep.subr.bf16.mxu0 %v3739_v29  ;;  %v2754_v35 = vld [vmem:[%s4447_s30] sm:$0xff] }
 0x15c   : > { %v1188_v43 = vadd.f32 %v1187_v39, %v4289_v47  ;;  %v1189_v44 = vpop.f32.mrb[34].mxu1  ;;  %2199 = vmatprep.mubr.bf16.mxu0 %v1614_v33  ;;  %v3767_v33 = vmov 0  }
 0x15d   : > { %v1190_v45 = vadd.f32 %v1189_v44, %v4284_v46  ;;  %v1191_v14 = vpop.f32.mrb[35].mxu1  ;;  %2200 = vmatmul.mubr.bf16.gmra.mrb[28].mxu0 %v1613_v32  ;;  %v1521_v50 = vmax.f32 %v1186_v38, 0.0  ;;  %3501 = vset.pattern.permute.xlu0 %v3767_v33 }
 0x15e   : > { %v1192_v48 = vadd.f32 %v1191_v14, %v4289_v47  ;;  %2319 = vmatpush1.bf16.msra.mxu0 %v3737_v37  ;;  %v1522_v54 = vmax.f32 %v1188_v43, 0.0  ;;  %3502 = vset.pattern.permute.xlu1 %v3767_v33  ;;  %v2755_v14 = vld [vmem:[%s4447_s30 + $0x8] sm:$0xff] }
 0x15f   : > { %v1525_v51 = vmax.f32 %v1190_v45, 0.0  ;;  %2320 = vmatprep.subr.bf16.mxu0 %v3742_v42  ;;  %2788 = vperm.xlu0 %3501, %v2754_v35  }
 0x160   : > { %v1526_v55 = vmax.f32 %v1192_v48, 0.0 }
 0x161   : > { %v1617_v56 = vpack.c.bf16 %v1525_v51, %v1521_v50  ;;  %v2756_v50 = vld [vmem:[%s4447_s30 + $0x10] sm:$0xff] }
 0x162   : > { %v1618_v57 = vpack.c.bf16 %v1526_v55, %v1522_v54  ;;  %v1195_v58 = vpop.f32.mrb[36].mxu1  ;;  %2321 = vmatpush1.bf16.msra.mxu0 %v3740_v49  ;;  %2798 = vperm.xlu1 %3502, %v2756_v50  }
 0x163   : > { %v1196_v59 = vadd.f32 %v1195_v58, %v4284_v46  ;;  %v1197_v62 = vpop.f32.mrb[37].mxu1  ;;  %2793 = vperm.xlu0 %3501, %v2755_v14   ;;  %v2766_v14 = vld [vmem:[%s4447_s30 + $0x60] sm:$0xff] }
 0x164   : > { %v1198_v63 = vadd.f32 %v1197_v62, %v4289_v47  ;;  %v1199_v0 = vpop.f32.mrb[38].mxu1  ;;  %2209 = vmatprep.mubr.bf16.mxu0 %v1618_v57 }
 0x165   : > { %v1200_v1 = vadd.f32 %v1199_v0, %v4284_v46  ;;  %v1201_v2 = vpop.f32.mrb[39].mxu1  ;;  %2210 = vmatmul.mubr.bf16.gmra.mrb[32].mxu0 %v1617_v56  ;;  %v1529_v4 = vmax.f32 %v1196_v59, 0.0  ;;  %v2757_v59 = vld [vmem:[%s4447_s30 + $0x18] sm:$0xff] }
 0x166   : > { %v1202_v3 = vadd.f32 %v1201_v2, %v4289_v47  ;;  %v1530_v8 = vmax.f32 %v1198_v63, 0.0  ;;  %2803 = vperm.xlu1 %3502, %v2757_v59  }
 0x167   : > { %v1533_v5 = vmax.f32 %v1200_v1, 0.0 }
 0x168   : > { %v1534_v13 = vmax.f32 %v1202_v3, 0.0 }
 0x169   : > { %v1621_v9 = vpack.c.bf16 %v1533_v5, %v1529_v4 }
 0x16a   : > { %v1622_v52 = vpack.c.bf16 %v1534_v13, %v1530_v8  ;;  %v1205_v53 = vpop.f32.mrb[40].mxu1  ;;  %v2759_v8 = vld [vmem:[%s4447_s30 + $0x28] sm:$0xff]  ;;  %v2758_v13 = vld [vmem:[%s4447_s30 + $0x20] sm:$0xff] }
 0x16b   : > { %v1206_v60 = vadd.f32 %v1205_v53, %v4284_v46  ;;  %v1207_v10 = vpop.f32.mrb[41].mxu1  ;;  %2813 = vperm.xlu1 %3502, %v2759_v8   ;;  %2808 = vperm.xlu0 %3501, %v2758_v13  }
 0x16c   : > { %v1208_v61 = vadd.f32 %v1207_v10, %v4289_v47  ;;  %v1209_v6 = vpop.f32.mrb[42].mxu1  ;;  %2219 = vmatprep.mubr.bf16.mxu0 %v1622_v52 }
 0x16d   : > { %v1210_v7 = vadd.f32 %v1209_v6, %v4284_v46  ;;  %v1211_v15 = vpop.f32.mrb[43].mxu1  ;;  %2220 = vmatmul.mubr.bf16.gmra.mrb[36].mxu0 %v1621_v9  ;;  %v1537_v17 = vmax.f32 %v1206_v60, 0.0  ;;  %v2761_v6 = vld [vmem:[%s4447_s30 + $0x38] sm:$0xff] }
 0x16e   : > { %v1212_v16 = vadd.f32 %v1211_v15, %v4289_v47  ;;  %v1538_v19 = vmax.f32 %v1208_v61, 0.0 }
 0x16f   : > { %v1541_v18 = vmax.f32 %v1210_v7, 0.0  ;;  %v2760_v7 = vld [vmem:[%s4447_s30 + $0x30] sm:$0xff]  ;;  %2823 = vperm.xlu1 %3502, %v2761_v6  }
 0x170   : > { %v1542_v20 = vmax.f32 %v1212_v16, 0.0  ;;  %2818 = vperm.xlu0 %3501, %v2760_v7  }
 0x171   : > { %v1625_v21 = vpack.c.bf16 %v1541_v18, %v1537_v17 }
 0x172   : > { %v1626_v22 = vpack.c.bf16 %v1542_v20, %v1538_v19  ;;  %v1215_v23 = vpop.f32.mrb[44].mxu1 }
 0x173   : > { %v1216_v24 = vadd.f32 %v1215_v23, %v4284_v46  ;;  %v1217_v11 = vpop.f32.mrb[45].mxu1  ;;  %v2763_v23 = vld [vmem:[%s4447_s30 + $0x48] sm:$0xff] }
 0x174   : > { %v1218_v25 = vadd.f32 %v1217_v11, %v4289_v47  ;;  %v1219_v26 = vpop.f32.mrb[46].mxu1  ;;  %2229 = vmatprep.mubr.bf16.mxu0 %v1626_v22  ;;  %2833 = vperm.xlu1 %3502, %v2763_v23  }
 0x175   : > { %v1220_v27 = vadd.f32 %v1219_v26, %v4284_v46  ;;  %v1221_v12 = vpop.f32.mrb[47].mxu1  ;;  %2230 = vmatmul.mubr.bf16.gmra.mrb[40].mxu0 %v1625_v21  ;;  %v1545_v29 = vmax.f32 %v1216_v24, 0.0  ;;  %v2762_v24 = vld [vmem:[%s4447_s30 + $0x40] sm:$0xff] }
 0x176   : > { %v1222_v28 = vadd.f32 %v1221_v12, %v4289_v47  ;;  %v1546_v31 = vmax.f32 %v1218_v25, 0.0  ;;  %2828 = vperm.xlu0 %3501, %v2762_v24  }
 0x177   : > { %v1549_v30 = vmax.f32 %v1220_v27, 0.0 }
 0x178   : > { %v1550_v32 = vmax.f32 %v1222_v28, 0.0 }
 0x179   : > { %v1629_v37 = vpack.c.bf16 %v1549_v30, %v1545_v29  ;;  %v2765_v29 = vld [vmem:[%s4447_s30 + $0x58] sm:$0xff]  ;;  %v2764_v30 = vld [vmem:[%s4447_s30 + $0x50] sm:$0xff] }
 0x17a   : > { %v1630_v38 = vpack.c.bf16 %v1550_v32, %v1546_v31  ;;  %v1225_v39 = vpop.f32.mrb[48].mxu1  ;;  %2843 = vperm.xlu1 %3502, %v2765_v29   ;;  %2838 = vperm.xlu0 %3501, %v2764_v30  }
 0x17b   : > { %v1226_v42 = vadd.f32 %v1225_v39, %v4284_v46  ;;  %v1227_v43 = vpop.f32.mrb[49].mxu1 }
 0x17c   : > { %v1228_v44 = vadd.f32 %v1227_v43, %v4289_v47  ;;  %v1229_v45 = vpop.f32.mrb[50].mxu1  ;;  %2239 = vmatprep.mubr.bf16.mxu0 %v1630_v38 }
 0x17d   : > { %v1230_v48 = vadd.f32 %v1229_v45, %v4284_v46  ;;  %v1231_v49 = vpop.f32.mrb[51].mxu1  ;;  %2240 = vmatmul.mubr.bf16.gmra.mrb[44].mxu0 %v1629_v37  ;;  %v1553_v54 = vmax.f32 %v1226_v42, 0.0  ;;  %v581_v37 = vsub.s32 2, %v4270_v34  ;;  %v585_v42 = vsub.s32 3, %v4270_v34  ;;  %v2767_v45 = vld [vmem:[%s4447_s30 + $0x68] sm:$0xff] }
 0x17e   : > { %v1232_v51 = vadd.f32 %v1231_v49, %v4289_v47  ;;  %v1554_v56 = vmax.f32 %v1228_v44, 0.0  ;;  %2853 = vperm.xlu1 %3502, %v2767_v45   ;;  %2848 = vperm.xlu0 %3501, %v2766_v14   ;;  %v2781_v45 = vld [vmem:[%s4447_s30 + $0xd8] sm:$0xff]  ;;  %v2780_v14 = vld [vmem:[%s4447_s30 + $0xd0] sm:$0xff] }
 0x17f   : > { %v1557_v55 = vmax.f32 %v1230_v48, 0.0 }
 0x180   : > { %v1558_v57 = vmax.f32 %v1232_v51, 0.0  ;;  %v4482_v51 = vrot.slane %v4277_v40, %v581_v37 }
 0x181   : > { %v1633_v58 = vpack.c.bf16 %v1557_v55, %v1553_v54 }
 0x182   : > { %v1634_v62 = vpack.c.bf16 %v1558_v57, %v1554_v56  ;;  %v1235_v63 = vpop.f32.mrb[52].mxu1  ;;  %v4485_v56 = vrot.slane %v4277_v40, %v585_v42  ;;  %v2769_v57 = vld [vmem:[%s4447_s30 + $0x78] sm:$0xff] }
 0x183   : > { %v1236_v0 = vadd.f32 %v1235_v63, %v4284_v46  ;;  %v1237_v1 = vpop.f32.mrb[53].mxu1  ;;  %2863 = vperm.xlu1 %3502, %v2769_v57  }
 0x184   : > { %v1238_v2 = vadd.f32 %v1237_v1, %v4289_v47  ;;  %v1239_v3 = vpop.f32.mrb[54].mxu1  ;;  %2249 = vmatprep.mubr.bf16.mxu0 %v1634_v62 }
 0x185   : > { %v1240_v4 = vadd.f32 %v1239_v3, %v4284_v46  ;;  %v1241_v5 = vpop.f32.mrb[55].mxu1  ;;  %2250 = vmatmul.mubr.bf16.gmra.mrb[48].mxu0 %v1633_v58  ;;  %v1561_v52 = vmax.f32 %v1236_v0, 0.0  ;;  %v2768_v58 = vld [vmem:[%s4447_s30 + $0x70] sm:$0xff]  ;;  %v2771_v3 = vld [vmem:[%s4447_s30 + $0x88] sm:$0xff] }
 0x186   : > { %v1242_v9 = vadd.f32 %v1241_v5, %v4289_v47  ;;  %v1562_v60 = vmax.f32 %v1238_v2, 0.0  ;;  %2858 = vperm.xlu0 %3501, %v2768_v58   ;;  %v2783_v58 = vld [vmem:[%s4447_s30 + $0xe8] sm:$0xff] }
 0x187   : > { %v1565_v53 = vmax.f32 %v1240_v4, 0.0  ;;  %v2770_v4 = vld [vmem:[%s4447_s30 + $0x80] sm:$0xff]  ;;  %2873 = vperm.xlu1 %3502, %v2771_v3   ;;  %v2785_v3 = vld [vmem:[%s4447_s30 + $0xf8] sm:$0xff] }
 0x188   : > { %v1566_v10 = vmax.f32 %v1242_v9, 0.0  ;;  %v2773_v9 = vld [vmem:[%s4447_s30 + $0x98] sm:$0xff] }
 0x189   : > { %v1637_v61 = vpack.c.bf16 %v1565_v53, %v1561_v52  ;;  %v2772_v52 = vld [vmem:[%s4447_s30 + $0x90] sm:$0xff] }
 0x18a   : > { %v1638_v15 = vpack.c.bf16 %v1566_v10, %v1562_v60  ;;  %v1245_v16 = vpop.f32.mrb[56].mxu1  ;;  %2868 = vperm.xlu0 %3501, %v2770_v4   ;;  %v2784_v4 = vld [vmem:[%s4447_s30 + $0xf0] sm:$0xff] }
 0x18b   : > { %v1246_v17 = vadd.f32 %v1245_v16, %v4284_v46  ;;  %v1247_v18 = vpop.f32.mrb[57].mxu1  ;;  %2883 = vperm.xlu1 %3502, %v2773_v9   ;;  %v2775_v16 = vld [vmem:[%s4447_s30 + $0xa8] sm:$0xff] }
 0x18c   : > { %v1248_v19 = vadd.f32 %v1247_v18, %v4289_v47  ;;  %v1249_v20 = vpop.f32.mrb[58].mxu1  ;;  %2259 = vmatprep.mubr.bf16.mxu0 %v1638_v15 }
 0x18d   : > { %v1250_v21 = vadd.f32 %v1249_v20, %v4284_v46  ;;  %v1251_v22 = vpop.f32.mrb[59].mxu1  ;;  %2260 = vmatmul.mubr.bf16.gmra.mrb[52].mxu0 %v1637_v61  ;;  %v1569_v25 = vmax.f32 %v1246_v17, 0.0  ;;  %v2774_v17 = vld [vmem:[%s4447_s30 + $0xa0] sm:$0xff] }
 0x18e   : > { %v1252_v11 = vadd.f32 %v1251_v22, %v4289_v47  ;;  %v1570_v27 = vmax.f32 %v1248_v19, 0.0  ;;  %2878 = vperm.xlu0 %3501, %v2772_v52  }
 0x18f   : > { %v1573_v26 = vmax.f32 %v1250_v21, 0.0  ;;  %2893 = vperm.xlu1 %3502, %v2775_v16  }
 0x190   : > { %v1574_v12 = vmax.f32 %v1252_v11, 0.0  ;;  %v2777_v11 = vld [vmem:[%s4447_s30 + $0xb8] sm:$0xff] }
 0x191   : > { %v1641_v28 = vpack.c.bf16 %v1573_v26, %v1569_v25  ;;  %v2776_v25 = vld [vmem:[%s4447_s30 + $0xb0] sm:$0xff] }
 0x192   : > { %v1642_v31 = vpack.c.bf16 %v1574_v12, %v1570_v27  ;;  %v1255_v32 = vpop.f32.mrb[60].mxu1  ;;  %2888 = vperm.xlu0 %3501, %v2774_v17  }
 0x193   : > { %v1256_v33 = vadd.f32 %v1255_v32, %v4284_v46  ;;  %v1257_v35 = vpop.f32.mrb[61].mxu1  ;;  %2903 = vperm.xlu1 %3502, %v2777_v11   ;;  %v2779_v32 = vld [vmem:[%s4447_s30 + $0xc8] sm:$0xff] }
 0x194   : > { %v1258_v38 = vadd.f32 %v1257_v35, %v4289_v47  ;;  %v1259_v39 = vpop.f32.mrb[62].mxu1  ;;  %2269 = vmatprep.mubr.bf16.mxu0 %v1642_v31 }
 0x195   : > { %v1260_v43 = vadd.f32 %v1259_v39, %v4284_v46  ;;  %v1261_v44 = vpop.f32.mrb[63].mxu1  ;;  %2270 = vmatmul.mubr.bf16.gmra.mrb[56].mxu0 %v1641_v28  ;;  %v1577_v49 = vmax.f32 %v1256_v33, 0.0  ;;  %v2778_v33 = vld [vmem:[%s4447_s30 + $0xc0] sm:$0xff] }
 0x196   : > { %v1262_v48 = vadd.f32 %v1261_v44, %v4289_v47  ;;  %v1578_v54 = vmax.f32 %v1258_v38, 0.0  ;;  %2898 = vperm.xlu0 %3501, %v2776_v25  }
 0x197   : > { %v1581_v50 = vmax.f32 %v1260_v43, 0.0  ;;  %2913 = vperm.xlu1 %3502, %v2779_v32  }
 0x198   : > { %v1582_v55 = vmax.f32 %v1262_v48, 0.0 }
 0x199   : > { %v1645_v46 = vpack.c.bf16 %v1581_v50, %v1577_v49 }
 0x19a   : > { %v1646_v59 = vpack.c.bf16 %v1582_v55, %v1578_v54  ;;  %v1298_v62 = vpop.f32.mrb[64].mxu1  ;;  %2908 = vperm.xlu0 %3501, %v2778_v33  }
 0x19b   : > { %v1299_v47 = vadd.f32 %v1298_v62, %v4482_v51  ;;  %v1300_v63 = vpop.f32.mrb[65].mxu1  ;;  %2923 = vperm.xlu1 %3502, %v2781_v45  }
 0x19c   : > { %v1301_v0 = vadd.f32 %v1300_v63, %v4485_v56  ;;  %v1302_v1 = vpop.f32.mrb[66].mxu1  ;;  %2279 = vmatprep.mubr.bf16.mxu0 %v1646_v59  ;;  %v2782_v59 = vld [vmem:[%s4447_s30 + $0xe0] sm:$0xff] }
 0x19d   : > { %v1303_v40 = vadd.f32 %v1302_v1, %v4482_v51  ;;  %v1304_v2 = vpop.f32.mrb[67].mxu1  ;;  %2280 = vmatmul.mubr.bf16.gmra.mrb[60].mxu0 %v1645_v46  ;;  %v1459_v8 = vmax.f32 %v1299_v47, 0.0 }
 0x19e   : > { %v1305_v5 = vadd.f32 %v1304_v2, %v4485_v56  ;;  %v1460_v53 = vmax.f32 %v1301_v0, 0.0  ;;  %2918 = vperm.xlu0 %3501, %v2780_v14  }
 0x19f   : > { %v1463_v13 = vmax.f32 %v1303_v40, 0.0  ;;  %2933 = vperm.xlu1 %3502, %v2783_v58  }
 0x1a0   : > { %v1464_v60 = vmax.f32 %v1305_v5, 0.0 }
 0x1a1   : > { %v1587_v10 = vpack.c.bf16 %v1463_v13, %v1459_v8 }
 0x1a2   : > { %v1588_v61 = vpack.c.bf16 %v1464_v60, %v1460_v53  ;;  %v1308_v6 = vpop.f32.mrb[68].mxu1  ;;  %2928 = vperm.xlu0 %3501, %v2782_v59  }
 0x1a3   : > { %v1309_v7 = vadd.f32 %v1308_v6, %v4482_v51  ;;  %v1310_v15 = vpop.f32.mrb[69].mxu1  ;;  %2943 = vperm.xlu1 %3502, %v2785_v3  }
 0x1a4   : > { %v1311_v18 = vadd.f32 %v1310_v15, %v4485_v56  ;;  %v1312_v19 = vpop.f32.mrb[70].mxu1  ;;  %2322 = vmatprep.mubr.bf16.mxu0 %v1588_v61 }
 0x1a5   : > { %v1313_v20 = vadd.f32 %v1312_v19, %v4482_v51  ;;  %v1314_v21 = vpop.f32.mrb[71].mxu1  ;;  %2323 = vmatmul.mubr.bf16.vlgmr.msra.gmra.mrb[0].mxu0 %v1587_v10  ;;  %v1467_v23 = vmax.f32 %v1309_v7, 0.0 }
 0x1a6   : > { %v1315_v22 = vadd.f32 %v1314_v21, %v4485_v56  ;;  %v1468_v26 = vmax.f32 %v1311_v18, 0.0  ;;  %2938 = vperm.xlu0 %3501, %v2784_v4  }
 0x1a7   : > { %v1471_v24 = vmax.f32 %v1313_v20, 0.0 }
 0x1a8   : > { %v1472_v27 = vmax.f32 %v1315_v22, 0.0 }
 0x1a9   : > { %v1591_v12 = vpack.c.bf16 %v1471_v24, %v1467_v23 }
 0x1aa   : > { %v1592_v28 = vpack.c.bf16 %v1472_v27, %v1468_v26  ;;  %v1318_v29 = vpop.f32.mrb[72].mxu1 }
 0x1ab   : > { %v1319_v30 = vadd.f32 %v1318_v29, %v4482_v51  ;;  %v1320_v31 = vpop.f32.mrb[73].mxu1 }
 0x1ac   : > { %v1321_v35 = vadd.f32 %v1320_v31, %v4485_v56  ;;  %v1322_v37 = vpop.f32.mrb[74].mxu1  ;;  %2332 = vmatprep.mubr.bf16.mxu0 %v1592_v28 }
 0x1ad   : > { %v1323_v38 = vadd.f32 %v1322_v37, %v4482_v51  ;;  %v1324_v39 = vpop.f32.mrb[75].mxu1  ;;  %2333 = vmatmul.mubr.bf16.gmra.mrb[4].mxu0 %v1591_v12  ;;  %v1475_v43 = vmax.f32 %v1319_v30, 0.0 }
 0x1ae   : > { %v1325_v42 = vadd.f32 %v1324_v39, %v4485_v56  ;;  %v1476_v48 = vmax.f32 %v1321_v35, 0.0 }
 0x1af   : > { %v1479_v44 = vmax.f32 %v1323_v38, 0.0 }
 0x1b0   : > { %v1480_v49 = vmax.f32 %v1325_v42, 0.0 }
 0x1b1   : > { %v1595_v50 = vpack.c.bf16 %v1479_v44, %v1475_v43 }
 0x1b2   : > { %v1596_v54 = vpack.c.bf16 %v1480_v49, %v1476_v48  ;;  %v1328_v55 = vpop.f32.mrb[76].mxu1 }
 0x1b3   : > { %v1329_v46 = vadd.f32 %v1328_v55, %v4482_v51  ;;  %v1330_v57 = vpop.f32.mrb[77].mxu1 }
 0x1b4   : > { %v1331_v62 = vadd.f32 %v1330_v57, %v4485_v56  ;;  %v1332_v47 = vpop.f32.mrb[78].mxu1  ;;  %2342 = vmatprep.mubr.bf16.mxu0 %v1596_v54 }
 0x1b5   : > { %v1333_v63 = vadd.f32 %v1332_v47, %v4482_v51  ;;  %v1334_v0 = vpop.f32.mrb[79].mxu1  ;;  %2343 = vmatmul.mubr.bf16.gmra.mrb[8].mxu0 %v1595_v50  ;;  %v1483_v40 = vmax.f32 %v1329_v46, 0.0 }
 0x1b6   : > { %v1335_v1 = vadd.f32 %v1334_v0, %v4485_v56  ;;  %v1484_v5 = vmax.f32 %v1331_v62, 0.0 }
 0x1b7   : > { %v1487_v2 = vmax.f32 %v1333_v63, 0.0 }
 0x1b8   : > { %v1488_v8 = vmax.f32 %v1335_v1, 0.0 }
 0x1b9   : > { %v1599_v13 = vpack.c.bf16 %v1487_v2, %v1483_v40 }
 0x1ba   : > { %v1600_v9 = vpack.c.bf16 %v1488_v8, %v1484_v5  ;;  %v1338_v52 = vpop.f32.mrb[80].mxu1 }
 0x1bb   : > { %v1339_v53 = vadd.f32 %v1338_v52, %v4482_v51  ;;  %v1340_v60 = vpop.f32.mrb[81].mxu1 }
 0x1bc   : > { %v1341_v10 = vadd.f32 %v1340_v60, %v4485_v56  ;;  %v1342_v61 = vpop.f32.mrb[82].mxu1  ;;  %2352 = vmatprep.mubr.bf16.mxu0 %v1600_v9 }
 0x1bd   : > { %v1343_v6 = vadd.f32 %v1342_v61, %v4482_v51  ;;  %v1344_v7 = vpop.f32.mrb[83].mxu1  ;;  %2353 = vmatmul.mubr.bf16.gmra.mrb[12].mxu0 %v1599_v13  ;;  %v1491_v16 = vmax.f32 %v1339_v53, 0.0 }
 0x1be   : > { %v1345_v15 = vadd.f32 %v1344_v7, %v4485_v56  ;;  %v1492_v18 = vmax.f32 %v1341_v10, 0.0 }
 0x1bf   : > { %v1495_v17 = vmax.f32 %v1343_v6, 0.0 }
 0x1c0   : > { %v1496_v19 = vmax.f32 %v1345_v15, 0.0 }
 0x1c1   : > { %v1603_v20 = vpack.c.bf16 %v1495_v17, %v1491_v16 }
 0x1c2   : > { %v1604_v21 = vpack.c.bf16 %v1496_v19, %v1492_v18  ;;  %v1348_v22 = vpop.f32.mrb[84].mxu1 }
 0x1c3   : > { %v1349_v23 = vadd.f32 %v1348_v22, %v4482_v51  ;;  %v1350_v24 = vpop.f32.mrb[85].mxu1 }
 0x1c4   : > { %v1351_v11 = vadd.f32 %v1350_v24, %v4485_v56  ;;  %v1352_v25 = vpop.f32.mrb[86].mxu1  ;;  %2362 = vmatprep.mubr.bf16.mxu0 %v1604_v21 }
 0x1c5   : > { %v1353_v26 = vadd.f32 %v1352_v25, %v4482_v51  ;;  %v1354_v27 = vpop.f32.mrb[87].mxu1  ;;  %2363 = vmatmul.mubr.bf16.gmra.mrb[16].mxu0 %v1603_v20  ;;  %v1499_v28 = vmax.f32 %v1349_v23, 0.0 }
 0x1c6   : > { %v1355_v12 = vadd.f32 %v1354_v27, %v4485_v56  ;;  %v1500_v30 = vmax.f32 %v1351_v11, 0.0 }
 0x1c7   : > { %v1503_v29 = vmax.f32 %v1353_v26, 0.0 }
 0x1c8   : > { %v1504_v31 = vmax.f32 %v1355_v12, 0.0 }
 0x1c9   : > { %v1607_v32 = vpack.c.bf16 %v1503_v29, %v1499_v28 }
 0x1ca   : > { %v1608_v33 = vpack.c.bf16 %v1504_v31, %v1500_v30  ;;  %v1358_v35 = vpop.f32.mrb[88].mxu1 }
 0x1cb   : > { %v1359_v37 = vadd.f32 %v1358_v35, %v4482_v51  ;;  %v1360_v38 = vpop.f32.mrb[89].mxu1 }
 0x1cc   : > { %v1361_v39 = vadd.f32 %v1360_v38, %v4485_v56  ;;  %v1362_v42 = vpop.f32.mrb[90].mxu1  ;;  %2372 = vmatprep.mubr.bf16.mxu0 %v1608_v33 }
 0x1cd   : > { %v1363_v43 = vadd.f32 %v1362_v42, %v4482_v51  ;;  %v1364_v44 = vpop.f32.mrb[91].mxu1  ;;  %2373 = vmatmul.mubr.bf16.gmra.mrb[20].mxu0 %v1607_v32  ;;  %v1507_v14 = vmax.f32 %v1359_v37, 0.0 }
 0x1ce   : > { %v1365_v45 = vadd.f32 %v1364_v44, %v4485_v56  ;;  %v1508_v49 = vmax.f32 %v1361_v39, 0.0 }
 0x1cf   : > { %v1511_v48 = vmax.f32 %v1363_v43, 0.0 }
 0x1d0   : > { %v1512_v50 = vmax.f32 %v1365_v45, 0.0 }
 0x1d1   : > { %v1611_v54 = vpack.c.bf16 %v1511_v48, %v1507_v14 }
 0x1d2   : > { %v1612_v55 = vpack.c.bf16 %v1512_v50, %v1508_v49  ;;  %v1368_v46 = vpop.f32.mrb[92].mxu1 }
 0x1d3   : > { %v1369_v57 = vadd.f32 %v1368_v46, %v4482_v51  ;;  %v1370_v58 = vpop.f32.mrb[93].mxu1 }
 0x1d4   : > { %v1371_v59 = vadd.f32 %v1370_v58, %v4485_v56  ;;  %v1372_v62 = vpop.f32.mrb[94].mxu1  ;;  %2382 = vmatprep.mubr.bf16.mxu0 %v1612_v55 }
 0x1d5   : > { %v1373_v47 = vadd.f32 %v1372_v62, %v4482_v51  ;;  %v1374_v63 = vpop.f32.mrb[95].mxu1  ;;  %2383 = vmatmul.mubr.bf16.gmra.mrb[24].mxu0 %v1611_v54  ;;  %v1515_v1 = vmax.f32 %v1369_v57, 0.0 }
 0x1d6   : > { %v1375_v0 = vadd.f32 %v1374_v63, %v4485_v56  ;;  %v1516_v2 = vmax.f32 %v1371_v59, 0.0 }
 0x1d7   : > { %v1519_v40 = vmax.f32 %v1373_v47, 0.0 }
 0x1d8   : > { %v1520_v3 = vmax.f32 %v1375_v0, 0.0 }
 0x1d9   : > { %v1615_v4 = vpack.c.bf16 %v1519_v40, %v1515_v1 }
 0x1da   : > { %v1616_v5 = vpack.c.bf16 %v1520_v3, %v1516_v2  ;;  %v1378_v8 = vpop.f32.mrb[96].mxu1 }
 0x1db   : > { %v1379_v13 = vadd.f32 %v1378_v8, %v4482_v51  ;;  %v1380_v9 = vpop.f32.mrb[97].mxu1 }
 0x1dc   : > { %v1381_v52 = vadd.f32 %v1380_v9, %v4485_v56  ;;  %v1382_v53 = vpop.f32.mrb[98].mxu1  ;;  %2392 = vmatprep.mubr.bf16.mxu0 %v1616_v5 }
 0x1dd   : > { %v1383_v60 = vadd.f32 %v1382_v53, %v4482_v51  ;;  %v1384_v10 = vpop.f32.mrb[99].mxu1  ;;  %2393 = vmatmul.mubr.bf16.gmra.mrb[28].mxu0 %v1615_v4  ;;  %v1523_v6 = vmax.f32 %v1379_v13, 0.0 }
 0x1de   : > { %v1385_v61 = vadd.f32 %v1384_v10, %v4485_v56  ;;  %v1524_v15 = vmax.f32 %v1381_v52, 0.0 }
 0x1df   : > { %v1527_v7 = vmax.f32 %v1383_v60, 0.0 }
 0x1e0   : > { %v1528_v16 = vmax.f32 %v1385_v61, 0.0 }
 0x1e1   : > { %v1619_v17 = vpack.c.bf16 %v1527_v7, %v1523_v6 }
 0x1e2   : > { %v1620_v18 = vpack.c.bf16 %v1528_v16, %v1524_v15  ;;  %v1388_v19 = vpop.f32.mrb[100].mxu1 }
 0x1e3   : > { %v1389_v20 = vadd.f32 %v1388_v19, %v4482_v51  ;;  %v1390_v21 = vpop.f32.mrb[101].mxu1 }
 0x1e4   : > { %v1391_v22 = vadd.f32 %v1390_v21, %v4485_v56  ;;  %v1392_v23 = vpop.f32.mrb[102].mxu1  ;;  %2402 = vmatprep.mubr.bf16.mxu0 %v1620_v18 }
 0x1e5   : > { %v1393_v24 = vadd.f32 %v1392_v23, %v4482_v51  ;;  %v1394_v11 = vpop.f32.mrb[103].mxu1  ;;  %2403 = vmatmul.mubr.bf16.gmra.mrb[32].mxu0 %v1619_v17  ;;  %v1531_v26 = vmax.f32 %v1389_v20, 0.0 }
 0x1e6   : > { %v1395_v25 = vadd.f32 %v1394_v11, %v4485_v56  ;;  %v1532_v12 = vmax.f32 %v1391_v22, 0.0 }
 0x1e7   : > { %v1535_v27 = vmax.f32 %v1393_v24, 0.0 }
 0x1e8   : > { %v1536_v28 = vmax.f32 %v1395_v25, 0.0 }
 0x1e9   : > { %v1623_v29 = vpack.c.bf16 %v1535_v27, %v1531_v26 }
 0x1ea   : > { %v1624_v30 = vpack.c.bf16 %v1536_v28, %v1532_v12  ;;  %v1398_v31 = vpop.f32.mrb[104].mxu1 }
 0x1eb   : > { %v1399_v32 = vadd.f32 %v1398_v31, %v4482_v51  ;;  %v1400_v33 = vpop.f32.mrb[105].mxu1 }
 0x1ec   : > { %v1401_v35 = vadd.f32 %v1400_v33, %v4485_v56  ;;  %v1402_v37 = vpop.f32.mrb[106].mxu1  ;;  %2412 = vmatprep.mubr.bf16.mxu0 %v1624_v30 }
 0x1ed   : > { %v1403_v38 = vadd.f32 %v1402_v37, %v4482_v51  ;;  %v1404_v39 = vpop.f32.mrb[107].mxu1  ;;  %2413 = vmatmul.mubr.bf16.gmra.mrb[36].mxu0 %v1623_v29  ;;  %v1539_v43 = vmax.f32 %v1399_v32, 0.0 }
 0x1ee   : > { %v1405_v42 = vadd.f32 %v1404_v39, %v4485_v56  ;;  %v1540_v45 = vmax.f32 %v1401_v35, 0.0 }
 0x1ef   : > { %v1543_v44 = vmax.f32 %v1403_v38, 0.0 }
 0x1f0   : > { %v1544_v14 = vmax.f32 %v1405_v42, 0.0 }
 0x1f1   : > { %v1627_v48 = vpack.c.bf16 %v1543_v44, %v1539_v43 }
 0x1f2   : > { %v1628_v49 = vpack.c.bf16 %v1544_v14, %v1540_v45  ;;  %v1408_v50 = vpop.f32.mrb[108].mxu1 }
 0x1f3   : > { %v1409_v54 = vadd.f32 %v1408_v50, %v4482_v51  ;;  %v1410_v55 = vpop.f32.mrb[109].mxu1 }
 0x1f4   : > { %v1411_v46 = vadd.f32 %v1410_v55, %v4485_v56  ;;  %v1412_v57 = vpop.f32.mrb[110].mxu1  ;;  %2422 = vmatprep.mubr.bf16.mxu0 %v1628_v49 }
 0x1f5   : > { %v1413_v58 = vadd.f32 %v1412_v57, %v4482_v51  ;;  %v1414_v59 = vpop.f32.mrb[111].mxu1  ;;  %2423 = vmatmul.mubr.bf16.gmra.mrb[40].mxu0 %v1627_v48  ;;  %v1547_v47 = vmax.f32 %v1409_v54, 0.0 }
 0x1f6   : > { %v1415_v62 = vadd.f32 %v1414_v59, %v4485_v56  ;;  %v1548_v0 = vmax.f32 %v1411_v46, 0.0 }
 0x1f7   : > { %v1551_v63 = vmax.f32 %v1413_v58, 0.0 }
 0x1f8   : > { %v1552_v1 = vmax.f32 %v1415_v62, 0.0 }
 0x1f9   : > { %v1631_v40 = vpack.c.bf16 %v1551_v63, %v1547_v47 }
 0x1fa   : > { %v1632_v2 = vpack.c.bf16 %v1552_v1, %v1548_v0  ;;  %v1418_v3 = vpop.f32.mrb[112].mxu1  ;;  %v2678_v1 = vld [vmem:[%s4727_s4] sm:$0x3] }
 0x1fb   : > { %v1419_v4 = vadd.f32 %v1418_v3, %v4482_v51  ;;  %v1420_v5 = vpop.f32.mrb[113].mxu1 }
 0x1fc   : > { %v1421_v8 = vadd.f32 %v1420_v5, %v4485_v56  ;;  %v1422_v13 = vpop.f32.mrb[114].mxu1  ;;  %2432 = vmatprep.mubr.bf16.mxu0 %v1632_v2 }
 0x1fd   : > { %v1423_v9 = vadd.f32 %v1422_v13, %v4482_v51  ;;  %v1424_v52 = vpop.f32.mrb[115].mxu1  ;;  %2433 = vmatmul.mubr.bf16.gmra.mrb[44].mxu0 %v1631_v40  ;;  %v1555_v60 = vmax.f32 %v1419_v4, 0.0  ;;  %v2789_v40 = vpop.permute.xlu0 %2788 }
 0x1fe   : > { %v1425_v53 = vadd.f32 %v1424_v52, %v4485_v56  ;;  %v1556_v61 = vmax.f32 %v1421_v8, 0.0 }
 0x1ff   : > { %v1559_v10 = vmax.f32 %v1423_v9, 0.0 }
 0x200   : > { %v1560_v6 = vmax.f32 %v1425_v53, 0.0 }
 0x201   : > { %v1635_v7 = vpack.c.bf16 %v1559_v10, %v1555_v60  ;;  %v2794_v34 = vpop.permute.xlu0 %2793  ;;  %v2799_v10 = vpop.permute.xlu1 %2798 }
 0x202   : > { %v1636_v15 = vpack.c.bf16 %v1560_v6, %v1556_v61  ;;  %v1428_v16 = vpop.f32.mrb[116].mxu1 }
 0x203   : > { %v1429_v17 = vadd.f32 %v1428_v16, %v4482_v51  ;;  %v1430_v18 = vpop.f32.mrb[117].mxu1 }
 0x204   : > { %v1431_v19 = vadd.f32 %v1430_v18, %v4485_v56  ;;  %v1432_v20 = vpop.f32.mrb[118].mxu1  ;;  %2442 = vmatprep.mubr.bf16.mxu0 %v1636_v15 }
 0x205   : > { %v1433_v21 = vadd.f32 %v1432_v20, %v4482_v51  ;;  %v1434_v22 = vpop.f32.mrb[119].mxu1  ;;  %2443 = vmatmul.mubr.bf16.gmra.mrb[48].mxu0 %v1635_v7  ;;  %v1563_v24 = vmax.f32 %v1429_v17, 0.0 }
 0x206   : > { %v1435_v23 = vadd.f32 %v1434_v22, %v4485_v56  ;;  %v1564_v25 = vmax.f32 %v1431_v19, 0.0 }
 0x207   : > { %v1567_v11 = vmax.f32 %v1433_v21, 0.0  ;;  %v2804_v21 = vpop.permute.xlu1 %2803 }
 0x208   : > { %v1568_v26 = vmax.f32 %v1435_v23, 0.0 }
 0x209   : > { %v1639_v27 = vpack.c.bf16 %v1567_v11, %v1563_v24 }
 0x20a   : > { %v1640_v12 = vpack.c.bf16 %v1568_v26, %v1564_v25  ;;  %v1438_v28 = vpop.f32.mrb[120].mxu1 }
 0x20b   : > { %v1439_v29 = vadd.f32 %v1438_v28, %v4482_v51  ;;  %v1440_v30 = vpop.f32.mrb[121].mxu1 }
 0x20c   : > { %v1441_v31 = vadd.f32 %v1440_v30, %v4485_v56  ;;  %v1442_v32 = vpop.f32.mrb[122].mxu1  ;;  %2452 = vmatprep.mubr.bf16.mxu0 %v1640_v12 }
 0x20d   : > { %v1443_v33 = vadd.f32 %v1442_v32, %v4482_v51  ;;  %v1444_v35 = vpop.f32.mrb[123].mxu1  ;;  %2453 = vmatmul.mubr.bf16.gmra.mrb[52].mxu0 %v1639_v27  ;;  %v1571_v38 = vmax.f32 %v1439_v29, 0.0  ;;  %v2809_v27 = vpop.permute.xlu0 %2808 }
 0x20e   : > { %v1445_v37 = vadd.f32 %v1444_v35, %v4485_v56  ;;  %v1572_v42 = vmax.f32 %v1441_v31, 0.0  ;;  %v2814_v32 = vpop.permute.xlu1 %2813 }
 0x20f   : > { %v1575_v39 = vmax.f32 %v1443_v33, 0.0 }
 0x210   : > { %v1576_v43 = vmax.f32 %v1445_v37, 0.0 }
 0x211   : > { %v1643_v44 = vpack.c.bf16 %v1575_v39, %v1571_v38 }
 0x212   : > { %v1644_v45 = vpack.c.bf16 %v1576_v43, %v1572_v42  ;;  %v1448_v14 = vpop.f32.mrb[124].mxu1 }
 0x213   : > { %v1449_v48 = vadd.f32 %v1448_v14, %v4482_v51  ;;  %v1450_v49 = vpop.f32.mrb[125].mxu1 }
 0x214   : > { %v1451_v50 = vadd.f32 %v1450_v49, %v4485_v56  ;;  %v1452_v54 = vpop.f32.mrb[126].mxu1  ;;  %2462 = vmatprep.mubr.bf16.mxu0 %v1644_v45 }
 0x215   : > { %v1453_v55 = vadd.f32 %v1452_v54, %v4482_v51  ;;  %v1454_v46 = vpop.f32.mrb[127].mxu1  ;;  %2463 = vmatmul.mubr.bf16.gmra.mrb[56].mxu0 %v1643_v44  ;;  %v1579_v58 = vmax.f32 %v1449_v48, 0.0  ;;  %v4574_v51 = vrot.slane %v2678_v1, %v573_v36  ;;  %v2819_v44 = vpop.permute.xlu0 %2818 }
 0x216   : > { %v1455_v57 = vadd.f32 %v1454_v46, %v4485_v56  ;;  %v1580_v62 = vmax.f32 %v1451_v50, 0.0  ;;  %v4578_v56 = vrot.slane %v2678_v1, %v577_v41  ;;  %v2824_v54 = vpop.permute.xlu1 %2823 }
 0x217   : > { %v1583_v59 = vmax.f32 %v1453_v55, 0.0 }
 0x218   : > { %v1584_v47 = vmax.f32 %v1455_v57, 0.0 }
 0x219   : > { %v1647_v63 = vpack.c.bf16 %v1583_v59, %v1579_v58 }
 0x21a   : > { %v1648_v0 = vpack.c.bf16 %v1584_v47, %v1580_v62 }
 0x21c   : > { %2472 = vmatprep.mubr.bf16.mxu0 %v1648_v0 }
 0x21d   : > { %2473 = vmatmul.mubr.bf16.gmra.mrb[60].mxu0 %v1647_v63  ;;  %v2829_v63 = vpop.permute.xlu0 %2828 }
 0x278   : > { %v2324_v2 = vpop.f32.mrb[0].mxu0 }
 0x279   : > { %v2690_v3 = vadd.f32 %v4574_v51, %v2324_v2  ;;  %v2326_v4 = vpop.f32.mrb[1].mxu0 }
 0x27a   : > { %v2691_v36 = vadd.f32 %v4578_v56, %v2326_v4  ;;  %v2328_v5 = vpop.f32.mrb[2].mxu0  ;;  %v2834_v4 = vpop.permute.xlu1 %2833 }
 0x27b   : > { %v2946_v41 = vmul.f32 %v2789_v40, %v2690_v3  ;;  %v2692_v8 = vadd.f32 %v4574_v51, %v2328_v5  ;;  %v2330_v13 = vpop.f32.mrb[3].mxu0 }
 0x27c   : > { %v2947_v9 = vmul.f32 %v2789_v40, %v2691_v36  ;;  %v2693_v52 = vadd.f32 %v4578_v56, %v2330_v13 }
 0x27d   : > { %3010 = vst [vmem:[%s4585_s12] sm:$0xff] %v2946_v41  ;;  %v2948_v53 = vmul.f32 %v2794_v34, %v2692_v8 }
 0x27e   : > { %3011 = vst [vmem:[%s4585_s12 + $0x8] sm:$0xff] %v2947_v9  ;;  %v2949_v60 = vmul.f32 %v2794_v34, %v2693_v52  ;;  %v2839_v52 = vpop.permute.xlu0 %2838 }
 0x27f   : > { %3012 = vst [vmem:[%s4585_s12 + $0x10] sm:$0xff] %v2948_v53 }
 0x280   : > { %3013 = vst [vmem:[%s4585_s12 + $0x18] sm:$0xff] %v2949_v60  ;;  %v2334_v61 = vpop.f32.mrb[4].mxu0 }
 0x281   : > { %v2694_v6 = vadd.f32 %v4574_v51, %v2334_v61  ;;  %v2336_v7 = vpop.f32.mrb[5].mxu0 }
 0x282   : > { %v2695_v15 = vadd.f32 %v4578_v56, %v2336_v7  ;;  %v2338_v16 = vpop.f32.mrb[6].mxu0  ;;  %v2844_v7 = vpop.permute.xlu1 %2843 }
 0x283   : > { %v2950_v17 = vmul.f32 %v2799_v10, %v2694_v6  ;;  %v2696_v18 = vadd.f32 %v4574_v51, %v2338_v16  ;;  %v2340_v19 = vpop.f32.mrb[7].mxu0 }
 0x284   : > { %v2951_v20 = vmul.f32 %v2799_v10, %v2695_v15  ;;  %v2697_v22 = vadd.f32 %v4578_v56, %v2340_v19 }
 0x285   : > { %3014 = vst [vmem:[%s4585_s12 + $0x20] sm:$0xff] %v2950_v17  ;;  %v2952_v23 = vmul.f32 %v2804_v21, %v2696_v18 }
 0x286   : > { %3015 = vst [vmem:[%s4585_s12 + $0x28] sm:$0xff] %v2951_v20  ;;  %v2953_v24 = vmul.f32 %v2804_v21, %v2697_v22  ;;  %v2849_v22 = vpop.permute.xlu0 %2848 }
 0x287   : > { %3016 = vst [vmem:[%s4585_s12 + $0x30] sm:$0xff] %v2952_v23 }
 0x288   : > { %3017 = vst [vmem:[%s4585_s12 + $0x38] sm:$0xff] %v2953_v24  ;;  %v2344_v11 = vpop.f32.mrb[8].mxu0 }
 0x289   : > { %v2698_v25 = vadd.f32 %v4574_v51, %v2344_v11  ;;  %v2346_v26 = vpop.f32.mrb[9].mxu0 }
 0x28a   : > { %v2699_v12 = vadd.f32 %v4578_v56, %v2346_v26  ;;  %v2348_v28 = vpop.f32.mrb[10].mxu0 }
 0x28b   : > { %v2954_v29 = vmul.f32 %v2809_v27, %v2698_v25  ;;  %v2700_v30 = vadd.f32 %v4574_v51, %v2348_v28  ;;  %v2350_v31 = vpop.f32.mrb[11].mxu0 }
 0x28c   : > { %v2955_v33 = vmul.f32 %v2809_v27, %v2699_v12  ;;  %v2701_v35 = vadd.f32 %v4578_v56, %v2350_v31  ;;  %v2854_v27 = vpop.permute.xlu1 %2853 }
 0x28d   : > { %3018 = vst [vmem:[%s4585_s12 + $0x40] sm:$0xff] %v2954_v29  ;;  %v2956_v37 = vmul.f32 %v2814_v32, %v2700_v30 }
 0x28e   : > { %3019 = vst [vmem:[%s4585_s12 + $0x48] sm:$0xff] %v2955_v33  ;;  %v2957_v38 = vmul.f32 %v2814_v32, %v2701_v35  ;;  %v2859_v35 = vpop.permute.xlu0 %2858 }
 0x28f   : > { %3020 = vst [vmem:[%s4585_s12 + $0x50] sm:$0xff] %v2956_v37 }
 0x290   : > { %3021 = vst [vmem:[%s4585_s12 + $0x58] sm:$0xff] %v2957_v38  ;;  %v2354_v39 = vpop.f32.mrb[12].mxu0 }
 0x291   : > { %v2702_v42 = vadd.f32 %v4574_v51, %v2354_v39  ;;  %v2356_v43 = vpop.f32.mrb[13].mxu0 }
 0x292   : > { %v2703_v45 = vadd.f32 %v4578_v56, %v2356_v43  ;;  %v2358_v14 = vpop.f32.mrb[14].mxu0 }
 0x293   : > { %v2958_v48 = vmul.f32 %v2819_v44, %v2702_v42  ;;  %v2704_v49 = vadd.f32 %v4574_v51, %v2358_v14  ;;  %v2360_v50 = vpop.f32.mrb[15].mxu0 }
 0x294   : > { %v2959_v55 = vmul.f32 %v2819_v44, %v2703_v45  ;;  %v2705_v46 = vadd.f32 %v4578_v56, %v2360_v50  ;;  %v2864_v44 = vpop.permute.xlu1 %2863 }
 0x295   : > { %3022 = vst [vmem:[%s4585_s12 + $0x60] sm:$0xff] %v2958_v48  ;;  %v2960_v57 = vmul.f32 %v2824_v54, %v2704_v49 }
 0x296   : > { %3023 = vst [vmem:[%s4585_s12 + $0x68] sm:$0xff] %v2959_v55  ;;  %v2961_v58 = vmul.f32 %v2824_v54, %v2705_v46  ;;  %v2869_v46 = vpop.permute.xlu0 %2868 }
 0x297   : > { %3024 = vst [vmem:[%s4585_s12 + $0x70] sm:$0xff] %v2960_v57 }
 0x298   : > { %3025 = vst [vmem:[%s4585_s12 + $0x78] sm:$0xff] %v2961_v58  ;;  %v2364_v59 = vpop.f32.mrb[16].mxu0 }
 0x299   : > { %v2706_v62 = vadd.f32 %v4574_v51, %v2364_v59  ;;  %v2366_v47 = vpop.f32.mrb[17].mxu0 }
 0x29a   : > { %v2707_v0 = vadd.f32 %v4578_v56, %v2366_v47  ;;  %v2368_v1 = vpop.f32.mrb[18].mxu0 }
 0x29b   : > { %v2962_v40 = vmul.f32 %v2829_v63, %v2706_v62  ;;  %v2708_v2 = vadd.f32 %v4574_v51, %v2368_v1  ;;  %v2370_v3 = vpop.f32.mrb[19].mxu0 }
 0x29c   : > { %v2963_v36 = vmul.f32 %v2829_v63, %v2707_v0  ;;  %v2709_v5 = vadd.f32 %v4578_v56, %v2370_v3  ;;  %v2874_v63 = vpop.permute.xlu1 %2873 }
 0x29d   : > { %3026 = vst [vmem:[%s4585_s12 + $0x80] sm:$0xff] %v2962_v40  ;;  %v2964_v34 = vmul.f32 %v2834_v4, %v2708_v2 }
 0x29e   : > { %3027 = vst [vmem:[%s4585_s12 + $0x88] sm:$0xff] %v2963_v36  ;;  %v2965_v41 = vmul.f32 %v2834_v4, %v2709_v5  ;;  %v2879_v5 = vpop.permute.xlu0 %2878 }
 0x29f   : > { %3028 = vst [vmem:[%s4585_s12 + $0x90] sm:$0xff] %v2964_v34 }
 0x2a0   : > { %3029 = vst [vmem:[%s4585_s12 + $0x98] sm:$0xff] %v2965_v41  ;;  %v2374_v8 = vpop.f32.mrb[20].mxu0 }
 0x2a1   : > { %v2710_v13 = vadd.f32 %v4574_v51, %v2374_v8  ;;  %v2376_v9 = vpop.f32.mrb[21].mxu0 }
 0x2a2   : > { %v2711_v53 = vadd.f32 %v4578_v56, %v2376_v9  ;;  %v2378_v60 = vpop.f32.mrb[22].mxu0 }
 0x2a3   : > { %v2966_v10 = vmul.f32 %v2839_v52, %v2710_v13  ;;  %v2712_v61 = vadd.f32 %v4574_v51, %v2378_v60  ;;  %v2380_v6 = vpop.f32.mrb[23].mxu0 }
 0x2a4   : > { %v2967_v15 = vmul.f32 %v2839_v52, %v2711_v53  ;;  %v2713_v16 = vadd.f32 %v4578_v56, %v2380_v6  ;;  %v2884_v52 = vpop.permute.xlu1 %2883 }
 0x2a5   : > { %3030 = vst [vmem:[%s4585_s12 + $0xa0] sm:$0xff] %v2966_v10  ;;  %v2968_v17 = vmul.f32 %v2844_v7, %v2712_v61 }
 0x2a6   : > { %3031 = vst [vmem:[%s4585_s12 + $0xa8] sm:$0xff] %v2967_v15  ;;  %v2969_v18 = vmul.f32 %v2844_v7, %v2713_v16  ;;  %v2889_v16 = vpop.permute.xlu0 %2888 }
 0x2a7   : > { %3032 = vst [vmem:[%s4585_s12 + $0xb0] sm:$0xff] %v2968_v17 }
 0x2a8   : > { %3033 = vst [vmem:[%s4585_s12 + $0xb8] sm:$0xff] %v2969_v18  ;;  %v2384_v19 = vpop.f32.mrb[24].mxu0 }
 0x2a9   : > { %v2714_v20 = vadd.f32 %v4574_v51, %v2384_v19  ;;  %v2386_v21 = vpop.f32.mrb[25].mxu0 }
 0x2aa   : > { %v2715_v23 = vadd.f32 %v4578_v56, %v2386_v21  ;;  %v2388_v24 = vpop.f32.mrb[26].mxu0 }
 0x2ab   : > { %v2970_v11 = vmul.f32 %v2849_v22, %v2714_v20  ;;  %v2716_v25 = vadd.f32 %v4574_v51, %v2388_v24  ;;  %v2390_v26 = vpop.f32.mrb[27].mxu0 }
 0x2ac   : > { %v2971_v12 = vmul.f32 %v2849_v22, %v2715_v23  ;;  %v2717_v28 = vadd.f32 %v4578_v56, %v2390_v26  ;;  %v2894_v22 = vpop.permute.xlu1 %2893 }
 0x2ad   : > { %3034 = vst [vmem:[%s4585_s12 + $0xc0] sm:$0xff] %v2970_v11  ;;  %v2972_v29 = vmul.f32 %v2854_v27, %v2716_v25 }
 0x2ae   : > { %3035 = vst [vmem:[%s4585_s12 + $0xc8] sm:$0xff] %v2971_v12  ;;  %v2973_v30 = vmul.f32 %v2854_v27, %v2717_v28  ;;  %v2899_v28 = vpop.permute.xlu0 %2898 }
 0x2af   : > { %3036 = vst [vmem:[%s4585_s12 + $0xd0] sm:$0xff] %v2972_v29 }
 0x2b0   : > { %3037 = vst [vmem:[%s4585_s12 + $0xd8] sm:$0xff] %v2973_v30  ;;  %v2394_v31 = vpop.f32.mrb[28].mxu0 }
 0x2b1   : > { %v2718_v32 = vadd.f32 %v4574_v51, %v2394_v31  ;;  %v2396_v33 = vpop.f32.mrb[29].mxu0 }
 0x2b2   : > { %v2719_v37 = vadd.f32 %v4578_v56, %v2396_v33  ;;  %v2398_v38 = vpop.f32.mrb[30].mxu0 }
 0x2b3   : > { %v2974_v39 = vmul.f32 %v2859_v35, %v2718_v32  ;;  %v2720_v42 = vadd.f32 %v4574_v51, %v2398_v38  ;;  %v2400_v43 = vpop.f32.mrb[31].mxu0 }
 0x2b4   : > { %v2975_v45 = vmul.f32 %v2859_v35, %v2719_v37  ;;  %v2721_v14 = vadd.f32 %v4578_v56, %v2400_v43  ;;  %v2904_v35 = vpop.permute.xlu1 %2903 }
 0x2b5   : > { %3038 = vst [vmem:[%s4585_s12 + $0xe0] sm:$0xff] %v2974_v39  ;;  %v2976_v48 = vmul.f32 %v2864_v44, %v2720_v42 }
 0x2b6   : > { %3039 = vst [vmem:[%s4585_s12 + $0xe8] sm:$0xff] %v2975_v45  ;;  %v2977_v49 = vmul.f32 %v2864_v44, %v2721_v14  ;;  %v2909_v14 = vpop.permute.xlu0 %2908 }
 0x2b7   : > { %3040 = vst [vmem:[%s4585_s12 + $0xf0] sm:$0xff] %v2976_v48 }
 0x2b8   : > { %3041 = vst [vmem:[%s4585_s12 + $0xf8] sm:$0xff] %v2977_v49  ;;  %v2404_v50 = vpop.f32.mrb[32].mxu0 }
 0x2b9   : > { %v2722_v54 = vadd.f32 %v4574_v51, %v2404_v50  ;;  %v2406_v55 = vpop.f32.mrb[33].mxu0 }
 0x2ba   : > { %v2723_v57 = vadd.f32 %v4578_v56, %v2406_v55  ;;  %v2408_v58 = vpop.f32.mrb[34].mxu0 }
 0x2bb   : > { %v2978_v59 = vmul.f32 %v2869_v46, %v2722_v54  ;;  %v2724_v62 = vadd.f32 %v4574_v51, %v2408_v58  ;;  %v2410_v47 = vpop.f32.mrb[35].mxu0 }
 0x2bc   : > { %v2979_v0 = vmul.f32 %v2869_v46, %v2723_v57  ;;  %v2725_v1 = vadd.f32 %v4578_v56, %v2410_v47  ;;  %v2914_v46 = vpop.permute.xlu1 %2913 }
 0x2bd   : > { %3042 = vst [vmem:[%s4585_s12 + $0x100] sm:$0xff] %v2978_v59  ;;  %v2980_v40 = vmul.f32 %v2874_v63, %v2724_v62 }
 0x2be   : > { %3043 = vst [vmem:[%s4585_s12 + $0x108] sm:$0xff] %v2979_v0  ;;  %v2981_v2 = vmul.f32 %v2874_v63, %v2725_v1  ;;  %v2919_v1 = vpop.permute.xlu0 %2918 }
 0x2bf   : > { %3044 = vst [vmem:[%s4585_s12 + $0x110] sm:$0xff] %v2980_v40 }
 0x2c0   : > { %3045 = vst [vmem:[%s4585_s12 + $0x118] sm:$0xff] %v2981_v2  ;;  %v2414_v3 = vpop.f32.mrb[36].mxu0 }
 0x2c1   : > { %v2726_v4 = vadd.f32 %v4574_v51, %v2414_v3  ;;  %v2416_v36 = vpop.f32.mrb[37].mxu0 }
 0x2c2   : > { %v2727_v34 = vadd.f32 %v4578_v56, %v2416_v36  ;;  %v2418_v41 = vpop.f32.mrb[38].mxu0 }
 0x2c3   : > { %v2982_v8 = vmul.f32 %v2879_v5, %v2726_v4  ;;  %v2728_v13 = vadd.f32 %v4574_v51, %v2418_v41  ;;  %v2420_v9 = vpop.f32.mrb[39].mxu0 }
 0x2c4   : > { %v2983_v53 = vmul.f32 %v2879_v5, %v2727_v34  ;;  %v2729_v60 = vadd.f32 %v4578_v56, %v2420_v9  ;;  %v2924_v5 = vpop.permute.xlu1 %2923 }
 0x2c5   : > { %3046 = vst [vmem:[%s4585_s12 + $0x120] sm:$0xff] %v2982_v8  ;;  %v2984_v10 = vmul.f32 %v2884_v52, %v2728_v13 }
 0x2c6   : > { %3047 = vst [vmem:[%s4585_s12 + $0x128] sm:$0xff] %v2983_v53  ;;  %v2985_v61 = vmul.f32 %v2884_v52, %v2729_v60  ;;  %v2929_v60 = vpop.permute.xlu0 %2928 }
 0x2c7   : > { %3048 = vst [vmem:[%s4585_s12 + $0x130] sm:$0xff] %v2984_v10 }
 0x2c8   : > { %3049 = vst [vmem:[%s4585_s12 + $0x138] sm:$0xff] %v2985_v61  ;;  %v2424_v6 = vpop.f32.mrb[40].mxu0 }
 0x2c9   : > { %v2730_v7 = vadd.f32 %v4574_v51, %v2424_v6  ;;  %v2426_v15 = vpop.f32.mrb[41].mxu0 }
 0x2ca   : > { %v2731_v17 = vadd.f32 %v4578_v56, %v2426_v15  ;;  %v2428_v18 = vpop.f32.mrb[42].mxu0 }
 0x2cb   : > { %v2986_v19 = vmul.f32 %v2889_v16, %v2730_v7  ;;  %v2732_v20 = vadd.f32 %v4574_v51, %v2428_v18  ;;  %v2430_v21 = vpop.f32.mrb[43].mxu0 }
 0x2cc   : > { %v2987_v23 = vmul.f32 %v2889_v16, %v2731_v17  ;;  %v2733_v24 = vadd.f32 %v4578_v56, %v2430_v21  ;;  %v2934_v16 = vpop.permute.xlu1 %2933 }
 0x2cd   : > { %3050 = vst [vmem:[%s4585_s12 + $0x140] sm:$0xff] %v2986_v19  ;;  %v2988_v11 = vmul.f32 %v2894_v22, %v2732_v20 }
 0x2ce   : > { %3051 = vst [vmem:[%s4585_s12 + $0x148] sm:$0xff] %v2987_v23  ;;  %v2989_v25 = vmul.f32 %v2894_v22, %v2733_v24  ;;  %v2939_v24 = vpop.permute.xlu0 %2938 }
 0x2cf   : > { %3052 = vst [vmem:[%s4585_s12 + $0x150] sm:$0xff] %v2988_v11 }
 0x2d0   : > { %3053 = vst [vmem:[%s4585_s12 + $0x158] sm:$0xff] %v2989_v25  ;;  %v2434_v26 = vpop.f32.mrb[44].mxu0 }
 0x2d1   : > { %v2734_v27 = vadd.f32 %v4574_v51, %v2434_v26  ;;  %v2436_v12 = vpop.f32.mrb[45].mxu0 }
 0x2d2   : > { %v2735_v29 = vadd.f32 %v4578_v56, %v2436_v12  ;;  %v2438_v30 = vpop.f32.mrb[46].mxu0 }
 0x2d3   : > { %v2990_v31 = vmul.f32 %v2899_v28, %v2734_v27  ;;  %v2736_v32 = vadd.f32 %v4574_v51, %v2438_v30  ;;  %v2440_v33 = vpop.f32.mrb[47].mxu0 }
 0x2d4   : > { %v2991_v37 = vmul.f32 %v2899_v28, %v2735_v29  ;;  %v2737_v38 = vadd.f32 %v4578_v56, %v2440_v33  ;;  %v2944_v28 = vpop.permute.xlu1 %2943 }
 0x2d5   : > { %3054 = vst [vmem:[%s4585_s12 + $0x160] sm:$0xff] %v2990_v31  ;;  %v2992_v39 = vmul.f32 %v2904_v35, %v2736_v32 }
 0x2d6   : > { %3055 = vst [vmem:[%s4585_s12 + $0x168] sm:$0xff] %v2991_v37  ;;  %v2993_v42 = vmul.f32 %v2904_v35, %v2737_v38 }
 0x2d7   : > { %3056 = vst [vmem:[%s4585_s12 + $0x170] sm:$0xff] %v2992_v39 }
 0x2d8   : > { %3057 = vst [vmem:[%s4585_s12 + $0x178] sm:$0xff] %v2993_v42  ;;  %v2444_v43 = vpop.f32.mrb[48].mxu0 }
 0x2d9   : > { %v2738_v44 = vadd.f32 %v4574_v51, %v2444_v43  ;;  %v2446_v45 = vpop.f32.mrb[49].mxu0 }
 0x2da   : > { %v2739_v48 = vadd.f32 %v4578_v56, %v2446_v45  ;;  %v2448_v49 = vpop.f32.mrb[50].mxu0 }
 0x2db   : > { %v2994_v50 = vmul.f32 %v2909_v14, %v2738_v44  ;;  %v2740_v54 = vadd.f32 %v4574_v51, %v2448_v49  ;;  %v2450_v55 = vpop.f32.mrb[51].mxu0 }
 0x2dc   : > { %v2995_v57 = vmul.f32 %v2909_v14, %v2739_v48  ;;  %v2741_v58 = vadd.f32 %v4578_v56, %v2450_v55 }
 0x2dd   : > { %3058 = vst [vmem:[%s4585_s12 + $0x180] sm:$0xff] %v2994_v50  ;;  %v2996_v59 = vmul.f32 %v2914_v46, %v2740_v54 }
 0x2de   : > { %3059 = vst [vmem:[%s4585_s12 + $0x188] sm:$0xff] %v2995_v57  ;;  %v2997_v62 = vmul.f32 %v2914_v46, %v2741_v58 }
 0x2df   : > { %3060 = vst [vmem:[%s4585_s12 + $0x190] sm:$0xff] %v2996_v59 }
 0x2e0   : > { %3061 = vst [vmem:[%s4585_s12 + $0x198] sm:$0xff] %v2997_v62  ;;  %v2454_v47 = vpop.f32.mrb[52].mxu0 }
 0x2e1   : > { %v2742_v63 = vadd.f32 %v4574_v51, %v2454_v47  ;;  %v2456_v0 = vpop.f32.mrb[53].mxu0 }
 0x2e2   : > { %v2743_v40 = vadd.f32 %v4578_v56, %v2456_v0  ;;  %v2458_v2 = vpop.f32.mrb[54].mxu0 }
 0x2e3   : > { %v2998_v3 = vmul.f32 %v2919_v1, %v2742_v63  ;;  %v2744_v4 = vadd.f32 %v4574_v51, %v2458_v2  ;;  %v2460_v36 = vpop.f32.mrb[55].mxu0 }
 0x2e4   : > { %v2999_v34 = vmul.f32 %v2919_v1, %v2743_v40  ;;  %v2745_v41 = vadd.f32 %v4578_v56, %v2460_v36 }
 0x2e5   : > { %3062 = vst [vmem:[%s4585_s12 + $0x1a0] sm:$0xff] %v2998_v3  ;;  %v3000_v8 = vmul.f32 %v2924_v5, %v2744_v4 }
 0x2e6   : > { %3063 = vst [vmem:[%s4585_s12 + $0x1a8] sm:$0xff] %v2999_v34  ;;  %v3001_v13 = vmul.f32 %v2924_v5, %v2745_v41 }
 0x2e7   : > { %3064 = vst [vmem:[%s4585_s12 + $0x1b0] sm:$0xff] %v3000_v8 }
 0x2e8   : > { %3065 = vst [vmem:[%s4585_s12 + $0x1b8] sm:$0xff] %v3001_v13  ;;  %v2464_v9 = vpop.f32.mrb[56].mxu0 }
 0x2e9   : > { %v2746_v52 = vadd.f32 %v4574_v51, %v2464_v9  ;;  %v2466_v53 = vpop.f32.mrb[57].mxu0 }
 0x2ea   : > { %v2747_v10 = vadd.f32 %v4578_v56, %v2466_v53  ;;  %v2468_v61 = vpop.f32.mrb[58].mxu0 }
 0x2eb   : > { %v3002_v6 = vmul.f32 %v2929_v60, %v2746_v52  ;;  %v2748_v7 = vadd.f32 %v4574_v51, %v2468_v61  ;;  %v2470_v15 = vpop.f32.mrb[59].mxu0 }
 0x2ec   : > { %v3003_v17 = vmul.f32 %v2929_v60, %v2747_v10  ;;  %v2749_v18 = vadd.f32 %v4578_v56, %v2470_v15 }
 0x2ed   : > { %3066 = vst [vmem:[%s4585_s12 + $0x1c0] sm:$0xff] %v3002_v6  ;;  %v3004_v19 = vmul.f32 %v2934_v16, %v2748_v7 }
 0x2ee   : > { %3067 = vst [vmem:[%s4585_s12 + $0x1c8] sm:$0xff] %v3003_v17  ;;  %v3005_v20 = vmul.f32 %v2934_v16, %v2749_v18 }
 0x2ef   : > { %3068 = vst [vmem:[%s4585_s12 + $0x1d0] sm:$0xff] %v3004_v19 }
 0x2f0   : > { %3069 = vst [vmem:[%s4585_s12 + $0x1d8] sm:$0xff] %v3005_v20  ;;  %v2474_v21 = vpop.f32.mrb[60].mxu0 }
 0x2f1   : > { %v2750_v22 = vadd.f32 %v4574_v51, %v2474_v21  ;;  %v2476_v23 = vpop.f32.mrb[61].mxu0 }
 0x2f2   : > { %v2751_v11 = vadd.f32 %v4578_v56, %v2476_v23  ;;  %v2478_v25 = vpop.f32.mrb[62].mxu0 }
 0x2f3   : > { %v3006_v26 = vmul.f32 %v2939_v24, %v2750_v22  ;;  %v2752_v27 = vadd.f32 %v4574_v51, %v2478_v25  ;;  %v2480_v12 = vpop.f32.mrb[63].mxu0 }
 0x2f4   : > { %v3007_v29 = vmul.f32 %v2939_v24, %v2751_v11  ;;  %v2753_v30 = vadd.f32 %v4578_v56, %v2480_v12 }
 0x2f5   : > { %3070 = vst [vmem:[%s4585_s12 + $0x1e0] sm:$0xff] %v3006_v26  ;;  %v3008_v31 = vmul.f32 %v2944_v28, %v2752_v27 }
 0x2f6   : > { %3071 = vst [vmem:[%s4585_s12 + $0x1e8] sm:$0xff] %v3007_v29  ;;  %v3009_v32 = vmul.f32 %v2944_v28, %v2753_v30 }
 0x2f7   : > { %3072 = vst [vmem:[%s4585_s12 + $0x1f0] sm:$0xff] %v3008_v31 }
 0x2f8   : > { %3073 = vst [vmem:[%s4585_s12 + $0x1f8] sm:$0xff] %v3009_v32 }
 0x2f9 PF: > { %s16_s23 = sadd.s32 1, %s3765_s23   ;;  %s4730_s21 = smov %s3761_s22 }
 0x2fa   : > { %p13_p5 = scmp.ge.s32.totalorder %s16_s23, 4   ;;  %s4731_s22 = smov %s4733_s24 }
 0x2fc   :  { %15 = sbr.rel (!%p13_p5) target bundleno = 2 (0x2), region = 94 }

</bundles_post_ra>
